<compile_context>
chip_gen: v5e
topology: v5e:2x2
jax: 0.10.0
libtpu: 0.0.40
codegen_flags: <defaults>
</compile_context>

<pallas_src>
import functools

import jax
import jax.numpy as jnp
from jax import lax
from jax.experimental import pallas as pl
from jax.experimental.pallas import tpu as pltpu


# ----------------------------------------------------------------------------
# host-side helpers
# ----------------------------------------------------------------------------
def _make_masks_and_taps(H, W):
    """Edge masks (9, 1, S) f32 (zero the 'same'-padding border for each of
    the 9 taps of a flat h*W+w layout) and the static per-tap roll shifts."""
    S = H * W
    pos = jnp.arange(S, dtype=jnp.int32)
    hh = pos // W
    ww = pos % W
    masks, taps = [], []
    for kh in range(3):
        for kw in range(3):
            dh, dw = kh - 1, kw - 1
            m = ((hh + dh >= 0) & (hh + dh < H) &
                 (ww + dw >= 0) & (ww + dw < W)).astype(jnp.float32)
            masks.append(m)
            off = dh * W + dw
            taps.append((kh * 3 + kw, (-off) % S, off == 0))
    return jnp.stack(masks, axis=0).reshape(9, 1, S), tuple(taps)


# ----------------------------------------------------------------------------
# fused Block kernel (B images per grid step, channel-major flat-spatial)
# ----------------------------------------------------------------------------
def _block_kernel(taps, bp, precision,
                  x_ref, m_ref, w1_ref, b1_ref, w2_ref, b2_ref, o_ref):
    """x_ref  : (1, B*C_in, S)  input slab (rows ordered b*C_in + c)
       m_ref  : (9, 1, S)       per-tap edge masks
       w1_ref : (2*B*P, 9*B*C_in)  [sepconv1+BN1-scale ; skip1x1+BNskip-scale]
       b1_ref : (2*B*P, 1)         [BN1 shift ; BNskip shift]
       w2_ref : (B*P, 9*B*P)       sepconv2 + BN2-scale (block-diag over B)
       b2_ref : (B*P, 1)           BN2 shift
       o_ref  : (1, B*P, S)"""
    x = x_ref[0]                                       # (B*C_in, S)

    def im2col(a):
        # 9 taps: lane roll (XLU) + one mask-mul (VPU) each; MACs go to MXU.
        cols = []
        for k, shift, is_center in taps:
            if is_center:
                cols.append(a)                         # centre tap: no roll/mask
            else:
                shifted = pltpu.roll(a, shift=shift, axis=1)
                cols.append(shifted * m_ref[k])        # (1,S) mask broadcast
        return jnp.concatenate(cols, axis=0)           # (9*rows, S)

    # --- SepConv1 (Cin->P) + BN1-scale  AND  skip 1x1 + BNskip-scale:
    #     a single (2*B*P, 9*B*Cin) @ (9*B*Cin, S) MXU matmul ---------------
    y = jnp.dot(w1_ref[...], im2col(x),
                preferred_element_type=jnp.float32, precision=precision)
    y = y + b1_ref[...]                                # BN shifts
    a1 = jnp.maximum(y[:bp, :], 0.0)                   # rep-branch: ReLU
    sk = y[bp:, :]                                     # skip-branch

    # --- SepConv2 (P->P) + BN2-scale: one (B*P, 9*B*P) @ (9*B*P, S) dot ----
    y2 = jnp.dot(w2_ref[...], im2col(a1),
                 preferred_element_type=jnp.float32, precision=precision)
    y2 = y2 + b2_ref[...]

    # --- residual add + final ReLU; lane-dense (last dim = S) store --------
    o_ref[0] = jnp.maximum(y2 + sk, 0.0).astype(o_ref.dtype)


# ----------------------------------------------------------------------------
# wrapper
# ----------------------------------------------------------------------------
def block_forward(x_nchw, params, *, eps=1e-5, images_per_step=2,
                  precision=lax.Precision.HIGHEST):
    """Fused forward of the DeepCAM `Block` (default config, eval-mode BN).
       x_nchw: (N, C_in, H, W) f32; params holds PyTorch-layout weights."""
    N, C_in, H, W = x_nchw.shape
    S = H * W
    P = params["pw1"].shape[0]

    # B images packed per grid step (sublane axis); must divide N.
    B = max(1, min(images_per_step, N))
    while N % B != 0:
        B -= 1
    G = N // B

    # -- fold BN to per-channel scale/shift --------------------------------
    def fold_bn(gamma, beta, mean, var):
        scale = gamma / jnp.sqrt(var + eps)
        return scale, beta - mean * scale

    sc1, sh1 = fold_bn(*params["bn1"])
    sc2, sh2 = fold_bn(*params["bn2"])
    scs, shs = fold_bn(*params["bnskip"])

    # -- PyTorch-layout weights -> kernel-friendly 2D slabs -----------------
    dw1 = params["dw1"][:, 0].reshape(C_in, 9)         # (C_in, 9)   taps kh*3+kw
    pw1 = params["pw1"][:, :, 0, 0]                    # (P, C_in)
    dw2 = params["dw2"][:, 0].reshape(P, 9)            # (P, 9)
    pw2 = params["pw2"][:, :, 0, 0]                    # (P, P)
    wsk = params["wskip"][:, :, 0, 0]                  # (P, C_in)

    # im2col fold: W[p, k*C + c] = pw[p, c] * dw[c, k]
    def fold_sep(pw, dw):
        p_, c_ = pw.shape
        return (pw[:, None, :] * dw.T[None, :, :]).reshape(p_, 9 * c_)

    w1f = fold_sep(pw1, dw1) * sc1[:, None]            # (P, 9*C_in), BN1 scale folded
    w2f = fold_sep(pw2, dw2) * sc2[:, None]            # (P, 9*P),    BN2 scale folded
    # skip 1x1 -> zero-padded onto the centre-tap (k=4) columns, BNskip scale folded
    wskf = jnp.zeros((P, 9, C_in), jnp.float32).at[:, 4, :].set(wsk * scs[:, None])
    wskf = wskf.reshape(P, 9 * C_in)

    # block-diagonal expansion across the B images packed on the sublane axis
    eye = jnp.eye(B, dtype=jnp.float32)

    def block_diag(wf, cin):
        m = wf.shape[0]
        wr = wf.reshape(m, 9, cin)
        return jnp.einsum("bd,mkc->bmkdc", eye, wr).reshape(B * m, 9 * B * cin)

    W1 = jnp.concatenate([block_diag(w1f, C_in), block_diag(wskf, C_in)], axis=0)
    W2 = block_diag(w2f, P)                             # (B*P, 9*B*P)
    bias1 = jnp.concatenate([jnp.tile(sh1, B), jnp.tile(shs, B)]).reshape(2 * B * P, 1)
    bias2 = jnp.tile(sh2, B).reshape(B * P, 1)

    masks, taps = _make_masks_and_taps(H, W)            # (9, 1, S), static shifts

    # NCHW is channel-major: (N,C,H,W) -> (N/B, B*C, H*W) is a free reshape.
    x = x_nchw.reshape(G, B * C_in, S)

    kernel = functools.partial(_block_kernel, taps, B * P, precision)

    def full_spec(a):
        nd = a.ndim
        return pl.BlockSpec(a.shape, lambda g, _nd=nd: (0,) * _nd)

    out = pl.pallas_call(
        kernel,
        out_shape=jax.ShapeDtypeStruct((G, B * P, S), jnp.float32),
        grid=(G,),
        in_specs=[
            pl.BlockSpec((1, B * C_in, S), lambda g: (g, 0, 0)),
            full_spec(masks),
            full_spec(W1), full_spec(bias1),
            full_spec(W2), full_spec(bias2),
        ],
        out_specs=pl.BlockSpec((1, B * P, S), lambda g: (g, 0, 0)),
        compiler_params=pltpu.CompilerParams(
            dimension_semantics=("parallel",)),
    )(x, masks, W1, bias1, W2, bias2)

    # Output is already channel-major per image -> free reshape back to NCHW.
    return out.reshape(N, P, H, W)


# ----------------------------------------------------------------------------
# pure-JAX reference (mirrors the PyTorch Block forward, eval-mode BN)
# ----------------------------------------------------------------------------
def _reference(x, params, eps=1e-5):
    prec = lax.Precision.HIGHEST

    def sepconv_same(x, dw, pw):
        C = x.shape[1]
        y = lax.conv_general_dilated(
            x, dw, window_strides=(1, 1), padding=((1, 1), (1, 1)),
            dimension_numbers=("NCHW", "OIHW", "NCHW"),
            feature_group_count=C, precision=prec)
        return lax.conv_general_dilated(
            y, pw, window_strides=(1, 1), padding="VALID",
            dimension_numbers=("NCHW", "OIHW", "NCHW"), precision=prec)

    def bn(x, gamma, beta, mean, var):
        inv = 1.0 / jnp.sqrt(var + eps)
        return ((x - mean[None, :, None, None]) * (gamma * inv)[None, :, None, None]
                + beta[None, :, None, None])

    # rep = [SepConv1, BN1, ReLU, SepConv2, BN2]  (trailing ReLU dropped)
    h = sepconv_same(x, params["dw1"], params["pw1"])
    h = jax.nn.relu(bn(h, *params["bn1"]))
    h = sepconv_same(h, params["dw2"], params["pw2"])
    h = bn(h, *params["bn2"])
    # skip branch (planes != inplanes)
    sk = lax.conv_general_dilated(
        x, params["wskip"], window_strides=(1, 1), padding="VALID",
        dimension_numbers=("NCHW", "OIHW", "NCHW"), precision=prec)
    sk = bn(sk, *params["bnskip"])
    return jax.nn.relu(h + sk)


# ----------------------------------------------------------------------------
if __name__ == "__main__":
    # N=4 with 2 images/step -> grid=(2,) parallel: both v7x TensorCores busy.
    N, C_in, planes, H, W = 4, 4, 8, 16, 16

    key = jax.random.PRNGKey(0)
    ks = jax.random.split(key, 9)
    x = jax.random.normal(ks[0], (N, C_in, H, W), dtype=jnp.float32)

    def bn_params(k, c):
        k1, k2, k3, k4 = jax.random.split(k, 4)
        gamma = 1.0 + 0.1 * jax.random.normal(k1, (c,), jnp.float32)
        beta = 0.1 * jax.random.normal(k2, (c,), jnp.float32)
        mean = 0.1 * jax.random.normal(k3, (c,), jnp.float32)
        var = jax.random.uniform(k4, (c,), jnp.float32, minval=0.5, maxval=1.5)
        return (gamma, beta, mean, var)

    params = {
        "dw1": 0.2 * jax.random.normal(ks[1], (C_in, 1, 3, 3), jnp.float32),
        "pw1": 0.2 * jax.random.normal(ks[2], (planes, C_in, 1, 1), jnp.float32),
        "bn1": bn_params(ks[3], planes),
        "dw2": 0.2 * jax.random.normal(ks[4], (planes, 1, 3, 3), jnp.float32),
        "pw2": 0.2 * jax.random.normal(ks[5], (planes, planes, 1, 1), jnp.float32),
        "bn2": bn_params(ks[6], planes),
        "wskip": 0.2 * jax.random.normal(ks[7], (planes, C_in, 1, 1), jnp.float32),
        "bnskip": bn_params(ks[8], planes),
    }

    out = jax.block_until_ready(block_forward(x, params, images_per_step=2))
    ref = jax.block_until_ready(_reference(x, params))

    assert out.shape == (N, planes, H, W), out.shape
    max_err = float(jnp.max(jnp.abs(out - ref)))
    assert jnp.allclose(out, ref, atol=1e-4, rtol=1e-4), f"mismatch: {max_err}"

    print("KERNEL_OK")
</pallas_src>

<mosaic_0001>
module attributes {stable_mosaic.version = 11 : i64} {
  func.func @_block_kernel(%arg0: i32, %arg1: memref<1x8x256xf32, #tpu.memory_space<vmem>>, %arg2: memref<9x1x256xf32, #tpu.memory_space<vmem>>, %arg3: memref<32x72xf32, #tpu.memory_space<vmem>>, %arg4: memref<32x1xf32, #tpu.memory_space<vmem>>, %arg5: memref<16x144xf32, #tpu.memory_space<vmem>>, %arg6: memref<16x1xf32, #tpu.memory_space<vmem>>, %arg7: memref<1x16x256xf32, #tpu.memory_space<vmem>>) attributes {dimension_semantics = [#tpu.dimension_semantics<parallel>], iteration_bounds = array<i64: 2>, scalar_prefetch = 0 : i64, scratch_operands = 0 : i64, tpu.core_type = #tpu.core_type<tc>, window_params = [{transform_indices = @transform_0, window_bounds = array<i64: 1, 8, 256>}, {pipeline_mode = #tpu.pipeline_mode<synchronous>, transform_indices = @transform_1, window_bounds = array<i64: 9, 1, 256>}, {pipeline_mode = #tpu.pipeline_mode<synchronous>, transform_indices = @transform_2, window_bounds = array<i64: 32, 72>}, {pipeline_mode = #tpu.pipeline_mode<synchronous>, transform_indices = @transform_3, window_bounds = array<i64: 32, 1>}, {pipeline_mode = #tpu.pipeline_mode<synchronous>, transform_indices = @transform_4, window_bounds = array<i64: 16, 144>}, {pipeline_mode = #tpu.pipeline_mode<synchronous>, transform_indices = @transform_5, window_bounds = array<i64: 16, 1>}, {transform_indices = @transform_6, window_bounds = array<i64: 1, 16, 256>}]} {
    %c0 = arith.constant 0 : index
    %c0_0 = arith.constant 0 : index
    %c0_1 = arith.constant 0 : index
    %0 = vector.load %arg1[%c0, %c0_0, %c0_1] : memref<1x8x256xf32, #tpu.memory_space<vmem>>, vector<1x8x256xf32>
    %1 = vector.shape_cast %0 : vector<1x8x256xf32> to vector<8x256xf32>
    %c0_2 = arith.constant 0 : index
    %c0_3 = arith.constant 0 : index
    %2 = vector.load %arg3[%c0_2, %c0_3] : memref<32x72xf32, #tpu.memory_space<vmem>>, vector<32x72xf32>
    %c17_i32 = arith.constant 17 : i32
    %3 = tpu.dynamic_rotate %1 by %c17_i32 dim 1 : vector<8x256xf32>, i32 -> vector<8x256xf32>
    %c0_4 = arith.constant 0 : index
    %c0_5 = arith.constant 0 : index
    %c0_6 = arith.constant 0 : index
    %4 = vector.load %arg2[%c0_4, %c0_5, %c0_6] : memref<9x1x256xf32, #tpu.memory_space<vmem>>, vector<1x1x256xf32>
    %5 = vector.shape_cast %4 : vector<1x1x256xf32> to vector<1x256xf32>
    %6 = vector.broadcast %5 : vector<1x256xf32> to vector<8x256xf32>
    %7 = arith.mulf %3, %6 : vector<8x256xf32>
    %c16_i32 = arith.constant 16 : i32
    %8 = tpu.dynamic_rotate %1 by %c16_i32 dim 1 : vector<8x256xf32>, i32 -> vector<8x256xf32>
    %c1 = arith.constant 1 : index
    %c0_7 = arith.constant 0 : index
    %c0_8 = arith.constant 0 : index
    %9 = vector.load %arg2[%c1, %c0_7, %c0_8] : memref<9x1x256xf32, #tpu.memory_space<vmem>>, vector<1x1x256xf32>
    %10 = vector.shape_cast %9 : vector<1x1x256xf32> to vector<1x256xf32>
    %11 = vector.broadcast %10 : vector<1x256xf32> to vector<8x256xf32>
    %12 = arith.mulf %8, %11 : vector<8x256xf32>
    %c15_i32 = arith.constant 15 : i32
    %13 = tpu.dynamic_rotate %1 by %c15_i32 dim 1 : vector<8x256xf32>, i32 -> vector<8x256xf32>
    %c2 = arith.constant 2 : index
    %c0_9 = arith.constant 0 : index
    %c0_10 = arith.constant 0 : index
    %14 = vector.load %arg2[%c2, %c0_9, %c0_10] : memref<9x1x256xf32, #tpu.memory_space<vmem>>, vector<1x1x256xf32>
    %15 = vector.shape_cast %14 : vector<1x1x256xf32> to vector<1x256xf32>
    %16 = vector.broadcast %15 : vector<1x256xf32> to vector<8x256xf32>
    %17 = arith.mulf %13, %16 : vector<8x256xf32>
    %c1_i32 = arith.constant 1 : i32
    %18 = tpu.dynamic_rotate %1 by %c1_i32 dim 1 : vector<8x256xf32>, i32 -> vector<8x256xf32>
    %c3 = arith.constant 3 : index
    %c0_11 = arith.constant 0 : index
    %c0_12 = arith.constant 0 : index
    %19 = vector.load %arg2[%c3, %c0_11, %c0_12] : memref<9x1x256xf32, #tpu.memory_space<vmem>>, vector<1x1x256xf32>
    %20 = vector.shape_cast %19 : vector<1x1x256xf32> to vector<1x256xf32>
    %21 = vector.broadcast %20 : vector<1x256xf32> to vector<8x256xf32>
    %22 = arith.mulf %18, %21 : vector<8x256xf32>
    %c255_i32 = arith.constant 255 : i32
    %23 = tpu.dynamic_rotate %1 by %c255_i32 dim 1 : vector<8x256xf32>, i32 -> vector<8x256xf32>
    %c5 = arith.constant 5 : index
    %c0_13 = arith.constant 0 : index
    %c0_14 = arith.constant 0 : index
    %24 = vector.load %arg2[%c5, %c0_13, %c0_14] : memref<9x1x256xf32, #tpu.memory_space<vmem>>, vector<1x1x256xf32>
    %25 = vector.shape_cast %24 : vector<1x1x256xf32> to vector<1x256xf32>
    %26 = vector.broadcast %25 : vector<1x256xf32> to vector<8x256xf32>
    %27 = arith.mulf %23, %26 : vector<8x256xf32>
    %c241_i32 = arith.constant 241 : i32
    %28 = tpu.dynamic_rotate %1 by %c241_i32 dim 1 : vector<8x256xf32>, i32 -> vector<8x256xf32>
    %c6 = arith.constant 6 : index
    %c0_15 = arith.constant 0 : index
    %c0_16 = arith.constant 0 : index
    %29 = vector.load %arg2[%c6, %c0_15, %c0_16] : memref<9x1x256xf32, #tpu.memory_space<vmem>>, vector<1x1x256xf32>
    %30 = vector.shape_cast %29 : vector<1x1x256xf32> to vector<1x256xf32>
    %31 = vector.broadcast %30 : vector<1x256xf32> to vector<8x256xf32>
    %32 = arith.mulf %28, %31 : vector<8x256xf32>
    %c240_i32 = arith.constant 240 : i32
    %33 = tpu.dynamic_rotate %1 by %c240_i32 dim 1 : vector<8x256xf32>, i32 -> vector<8x256xf32>
    %c7 = arith.constant 7 : index
    %c0_17 = arith.constant 0 : index
    %c0_18 = arith.constant 0 : index
    %34 = vector.load %arg2[%c7, %c0_17, %c0_18] : memref<9x1x256xf32, #tpu.memory_space<vmem>>, vector<1x1x256xf32>
    %35 = vector.shape_cast %34 : vector<1x1x256xf32> to vector<1x256xf32>
    %36 = vector.broadcast %35 : vector<1x256xf32> to vector<8x256xf32>
    %37 = arith.mulf %33, %36 : vector<8x256xf32>
    %c239_i32 = arith.constant 239 : i32
    %38 = tpu.dynamic_rotate %1 by %c239_i32 dim 1 : vector<8x256xf32>, i32 -> vector<8x256xf32>
    %c8 = arith.constant 8 : index
    %c0_19 = arith.constant 0 : index
    %c0_20 = arith.constant 0 : index
    %39 = vector.load %arg2[%c8, %c0_19, %c0_20] : memref<9x1x256xf32, #tpu.memory_space<vmem>>, vector<1x1x256xf32>
    %40 = vector.shape_cast %39 : vector<1x1x256xf32> to vector<1x256xf32>
    %41 = vector.broadcast %40 : vector<1x256xf32> to vector<8x256xf32>
    %42 = arith.mulf %38, %41 : vector<8x256xf32>
    %43 = tpu.concatenate %7, %12, %17, %22, %1, %27, %32, %37, %42 in 0 : vector<8x256xf32>, vector<8x256xf32>, vector<8x256xf32>, vector<8x256xf32>, vector<8x256xf32>, vector<8x256xf32>, vector<8x256xf32>, vector<8x256xf32>, vector<8x256xf32> -> vector<72x256xf32>
    %cst = arith.constant dense<0.000000e+00> : vector<32x256xf32>
    %44 = tpu.matmul %2, %43, %cst {dimension_numbers = #tpu.dot_dimension_numbers<[1], [0], [0], [1], [0, 0, 1, 1], [], []>, precision = #tpu.contract_precision<fp32>} : vector<32x72xf32>, vector<72x256xf32>, vector<32x256xf32> -> vector<32x256xf32>
    %c0_21 = arith.constant 0 : index
    %c0_22 = arith.constant 0 : index
    %45 = vector.load %arg4[%c0_21, %c0_22] : memref<32x1xf32, #tpu.memory_space<vmem>>, vector<32x1xf32>
    %46 = vector.broadcast %45 : vector<32x1xf32> to vector<32x256xf32>
    %47 = arith.addf %44, %46 : vector<32x256xf32>
    %48 = vector.extract_strided_slice %47 {offsets = [0, 0], sizes = [16, 256], strides = [1, 1]} : vector<32x256xf32> to vector<16x256xf32>
    %cst_23 = arith.constant 0.000000e+00 : f32
    %49 = vector.broadcast %cst_23 : f32 to vector<16x256xf32>
    %50 = arith.maximumf %48, %49 : vector<16x256xf32>
    %51 = vector.extract_strided_slice %47 {offsets = [16, 0], sizes = [16, 256], strides = [1, 1]} : vector<32x256xf32> to vector<16x256xf32>
    %c0_24 = arith.constant 0 : index
    %c0_25 = arith.constant 0 : index
    %52 = vector.load %arg5[%c0_24, %c0_25] : memref<16x144xf32, #tpu.memory_space<vmem>>, vector<16x144xf32>
    %c17_i32_26 = arith.constant 17 : i32
    %53 = tpu.dynamic_rotate %50 by %c17_i32_26 dim 1 : vector<16x256xf32>, i32 -> vector<16x256xf32>
    %c0_27 = arith.constant 0 : index
    %c0_28 = arith.constant 0 : index
    %c0_29 = arith.constant 0 : index
    %54 = vector.load %arg2[%c0_27, %c0_28, %c0_29] : memref<9x1x256xf32, #tpu.memory_space<vmem>>, vector<1x1x256xf32>
    %55 = vector.shape_cast %54 : vector<1x1x256xf32> to vector<1x256xf32>
    %56 = vector.broadcast %55 : vector<1x256xf32> to vector<16x256xf32>
    %57 = arith.mulf %53, %56 : vector<16x256xf32>
    %c16_i32_30 = arith.constant 16 : i32
    %58 = tpu.dynamic_rotate %50 by %c16_i32_30 dim 1 : vector<16x256xf32>, i32 -> vector<16x256xf32>
    %c1_31 = arith.constant 1 : index
    %c0_32 = arith.constant 0 : index
    %c0_33 = arith.constant 0 : index
    %59 = vector.load %arg2[%c1_31, %c0_32, %c0_33] : memref<9x1x256xf32, #tpu.memory_space<vmem>>, vector<1x1x256xf32>
    %60 = vector.shape_cast %59 : vector<1x1x256xf32> to vector<1x256xf32>
    %61 = vector.broadcast %60 : vector<1x256xf32> to vector<16x256xf32>
    %62 = arith.mulf %58, %61 : vector<16x256xf32>
    %c15_i32_34 = arith.constant 15 : i32
    %63 = tpu.dynamic_rotate %50 by %c15_i32_34 dim 1 : vector<16x256xf32>, i32 -> vector<16x256xf32>
    %c2_35 = arith.constant 2 : index
    %c0_36 = arith.constant 0 : index
    %c0_37 = arith.constant 0 : index
    %64 = vector.load %arg2[%c2_35, %c0_36, %c0_37] : memref<9x1x256xf32, #tpu.memory_space<vmem>>, vector<1x1x256xf32>
    %65 = vector.shape_cast %64 : vector<1x1x256xf32> to vector<1x256xf32>
    %66 = vector.broadcast %65 : vector<1x256xf32> to vector<16x256xf32>
    %67 = arith.mulf %63, %66 : vector<16x256xf32>
    %c1_i32_38 = arith.constant 1 : i32
    %68 = tpu.dynamic_rotate %50 by %c1_i32_38 dim 1 : vector<16x256xf32>, i32 -> vector<16x256xf32>
    %c3_39 = arith.constant 3 : index
    %c0_40 = arith.constant 0 : index
    %c0_41 = arith.constant 0 : index
    %69 = vector.load %arg2[%c3_39, %c0_40, %c0_41] : memref<9x1x256xf32, #tpu.memory_space<vmem>>, vector<1x1x256xf32>
    %70 = vector.shape_cast %69 : vector<1x1x256xf32> to vector<1x256xf32>
    %71 = vector.broadcast %70 : vector<1x256xf32> to vector<16x256xf32>
    %72 = arith.mulf %68, %71 : vector<16x256xf32>
    %c255_i32_42 = arith.constant 255 : i32
    %73 = tpu.dynamic_rotate %50 by %c255_i32_42 dim 1 : vector<16x256xf32>, i32 -> vector<16x256xf32>
    %c5_43 = arith.constant 5 : index
    %c0_44 = arith.constant 0 : index
    %c0_45 = arith.constant 0 : index
    %74 = vector.load %arg2[%c5_43, %c0_44, %c0_45] : memref<9x1x256xf32, #tpu.memory_space<vmem>>, vector<1x1x256xf32>
    %75 = vector.shape_cast %74 : vector<1x1x256xf32> to vector<1x256xf32>
    %76 = vector.broadcast %75 : vector<1x256xf32> to vector<16x256xf32>
    %77 = arith.mulf %73, %76 : vector<16x256xf32>
    %c241_i32_46 = arith.constant 241 : i32
    %78 = tpu.dynamic_rotate %50 by %c241_i32_46 dim 1 : vector<16x256xf32>, i32 -> vector<16x256xf32>
    %c6_47 = arith.constant 6 : index
    %c0_48 = arith.constant 0 : index
    %c0_49 = arith.constant 0 : index
    %79 = vector.load %arg2[%c6_47, %c0_48, %c0_49] : memref<9x1x256xf32, #tpu.memory_space<vmem>>, vector<1x1x256xf32>
    %80 = vector.shape_cast %79 : vector<1x1x256xf32> to vector<1x256xf32>
    %81 = vector.broadcast %80 : vector<1x256xf32> to vector<16x256xf32>
    %82 = arith.mulf %78, %81 : vector<16x256xf32>
    %c240_i32_50 = arith.constant 240 : i32
    %83 = tpu.dynamic_rotate %50 by %c240_i32_50 dim 1 : vector<16x256xf32>, i32 -> vector<16x256xf32>
    %c7_51 = arith.constant 7 : index
    %c0_52 = arith.constant 0 : index
    %c0_53 = arith.constant 0 : index
    %84 = vector.load %arg2[%c7_51, %c0_52, %c0_53] : memref<9x1x256xf32, #tpu.memory_space<vmem>>, vector<1x1x256xf32>
    %85 = vector.shape_cast %84 : vector<1x1x256xf32> to vector<1x256xf32>
    %86 = vector.broadcast %85 : vector<1x256xf32> to vector<16x256xf32>
    %87 = arith.mulf %83, %86 : vector<16x256xf32>
    %c239_i32_54 = arith.constant 239 : i32
    %88 = tpu.dynamic_rotate %50 by %c239_i32_54 dim 1 : vector<16x256xf32>, i32 -> vector<16x256xf32>
    %c8_55 = arith.constant 8 : index
    %c0_56 = arith.constant 0 : index
    %c0_57 = arith.constant 0 : index
    %89 = vector.load %arg2[%c8_55, %c0_56, %c0_57] : memref<9x1x256xf32, #tpu.memory_space<vmem>>, vector<1x1x256xf32>
    %90 = vector.shape_cast %89 : vector<1x1x256xf32> to vector<1x256xf32>
    %91 = vector.broadcast %90 : vector<1x256xf32> to vector<16x256xf32>
    %92 = arith.mulf %88, %91 : vector<16x256xf32>
    %93 = tpu.concatenate %57, %62, %67, %72, %50, %77, %82, %87, %92 in 0 : vector<16x256xf32>, vector<16x256xf32>, vector<16x256xf32>, vector<16x256xf32>, vector<16x256xf32>, vector<16x256xf32>, vector<16x256xf32>, vector<16x256xf32>, vector<16x256xf32> -> vector<144x256xf32>
    %cst_58 = arith.constant dense<0.000000e+00> : vector<16x256xf32>
    %94 = tpu.matmul %52, %93, %cst_58 {dimension_numbers = #tpu.dot_dimension_numbers<[1], [0], [0], [1], [0, 0, 1, 1], [], []>, precision = #tpu.contract_precision<fp32>} : vector<16x144xf32>, vector<144x256xf32>, vector<16x256xf32> -> vector<16x256xf32>
    %c0_59 = arith.constant 0 : index
    %c0_60 = arith.constant 0 : index
    %95 = vector.load %arg6[%c0_59, %c0_60] : memref<16x1xf32, #tpu.memory_space<vmem>>, vector<16x1xf32>
    %96 = vector.broadcast %95 : vector<16x1xf32> to vector<16x256xf32>
    %97 = arith.addf %94, %96 : vector<16x256xf32>
    %98 = arith.addf %97, %51 : vector<16x256xf32>
    %cst_61 = arith.constant 0.000000e+00 : f32
    %99 = vector.broadcast %cst_61 : f32 to vector<16x256xf32>
    %100 = arith.maximumf %98, %99 : vector<16x256xf32>
    %c0_62 = arith.constant 0 : index
    %c0_63 = arith.constant 0 : index
    %c0_64 = arith.constant 0 : index
    %101 = vector.load %arg7[%c0_62, %c0_63, %c0_64] : memref<1x16x256xf32, #tpu.memory_space<vmem>>, vector<1x16x256xf32>
    %102 = vector.shape_cast %101 : vector<1x16x256xf32> to vector<16x256xf32>
    %103 = vector.shape_cast %100 : vector<16x256xf32> to vector<1x16x256xf32>
    tpu.vector_store %arg7[%c0_62, %c0_63, %c0_64], %103 {strides = array<i32>} : memref<1x16x256xf32, #tpu.memory_space<vmem>>, vector<1x16x256xf32>,
    return
  }
  func.func @transform_0(%arg0: i32) -> (i32, i32, i32) {
    %c0_i32 = arith.constant 0 : i32
    %c0_i32_0 = arith.constant 0 : i32
    %c0_i32_1 = arith.constant 0 : i32
    return %arg0, %c0_i32, %c0_i32_0 : i32, i32, i32
  }
  func.func @transform_1(%arg0: i32) -> (i32, i32, i32) {
    %c0_i32 = arith.constant 0 : i32
    %c0_i32_0 = arith.constant 0 : i32
    %c0_i32_1 = arith.constant 0 : i32
    %c0_i32_2 = arith.constant 0 : i32
    return %c0_i32, %c0_i32_0, %c0_i32_1 : i32, i32, i32
  }
  func.func @transform_2(%arg0: i32) -> (i32, i32) {
    %c0_i32 = arith.constant 0 : i32
    %c0_i32_0 = arith.constant 0 : i32
    %c0_i32_1 = arith.constant 0 : i32
    return %c0_i32, %c0_i32_0 : i32, i32
  }
  func.func @transform_3(%arg0: i32) -> (i32, i32) {
    %c0_i32 = arith.constant 0 : i32
    %c0_i32_0 = arith.constant 0 : i32
    %c0_i32_1 = arith.constant 0 : i32
    return %c0_i32, %c0_i32_0 : i32, i32
  }
  func.func @transform_4(%arg0: i32) -> (i32, i32) {
    %c0_i32 = arith.constant 0 : i32
    %c0_i32_0 = arith.constant 0 : i32
    %c0_i32_1 = arith.constant 0 : i32
    return %c0_i32, %c0_i32_0 : i32, i32
  }
  func.func @transform_5(%arg0: i32) -> (i32, i32) {
    %c0_i32 = arith.constant 0 : i32
    %c0_i32_0 = arith.constant 0 : i32
    %c0_i32_1 = arith.constant 0 : i32
    return %c0_i32, %c0_i32_0 : i32, i32
  }
  func.func @transform_6(%arg0: i32) -> (i32, i32, i32) {
    %c0_i32 = arith.constant 0 : i32
    %c0_i32_0 = arith.constant 0 : i32
    %c0_i32_1 = arith.constant 0 : i32
    return %arg0, %c0_i32, %c0_i32_0 : i32, i32, i32
  }
}

</mosaic_0001>

<bundles_post_ra>
// kernel: tpu_custom_call.1
= control target key start
LH: loop header
LB: loop body
LE: loop exit
PB: predicated region body
PF: predicated region fallthrough
CT: control target
= control target key end

     0   :  { %s4552_s0 = inlined_call_operand.vmem [shape: f32[2,8,256], index: 0, kind: input, shape index: {}]   ;;  %s4553_s1 = inlined_call_operand.hbm [shape: f32[9,1,256], index: 1, kind: input, shape index: {}]   ;;  %s4554_s2 = inlined_call_operand.hbm [shape: f32[32,72], index: 2, kind: input, shape index: {}]   ;;  %s4555_s3 = inlined_call_operand.vmem [shape: f32[32,1], index: 3, kind: input, shape index: {}]   ;;  %s4556_s4 = inlined_call_operand.hbm [shape: f32[16,144], index: 4, kind: input, shape index: {}]   ;;  %s4557_s5 = inlined_call_operand.vmem [shape: f32[16,1], index: 5, kind: input, shape index: {}]   ;;  %s4558_s6 = inlined_call_operand.hbm [shape: f32[2,16,256], index: 6, kind: output, shape index: {}]  }
   0x1   :  { %4626 = sst [smem:[#allocation56_spill]] %s4553_s1 }
   0x2   :  { %4627 = sst [smem:[#allocation57_spill]] %s4554_s2 }
   0x3   :  { %11 = vsyncpa [#allocation3], 0 }
   0x4   :  { %12 = vsyncpa [#allocation6], 0 }
   0x5   :  { %13 = vsyncpa [#allocation4], 0 }
   0x6   :  { %15 = vsyncpa [#allocation4 + $0x1], 0  ;;  %s2883_s21 = smov 0   ;;  %s2885_s22 = smov 0  }
   0x7   :  { %s2887_s23 = smov 0   ;;  %s2889_s24 = smov 0  }
   0x8 LB: > { %s2904_s25 = sadd.s32 4294967295, %s2827_s24   ;;  %s2558_s26 = sadd.s32 4294967294, %s2827_s24   ;;  %s2827_s24 = sphi %s2889_s24, %s4783_s24   ;;  %s2823_s23 = sphi %s2887_s23, %s4782_s23   ;;  %s2819_s22 = sphi %s2885_s22, %s4781_s22   ;;  %s2815_s21 = sphi %s2883_s21, %s4780_s21  }
   0x9   : > { %s2908_s27 = sadd.s32 1, %s2827_s24   ;;  %s159_s28 = sadd.s32 1, %s2823_s23 }
   0xa   : > { %s156_s29 = ssub.s32 %s2827_s24, %s2908_s27  ;;  %p169_p0 = scmp.ne.s32.totalorder %s2823_s23, %s2819_s22 }
   0xb   : > { %p157_p1 = scmp.eq.s32.totalorder %s156_s29, 0  ;;  %p170_p2 = scmp.eq.s32.totalorder %s2904_s25, 1 }
   0xc   : > { %p175_p3 = scmp.ne.s32.totalorder %s2819_s22, %s2815_s21  ;;  %p176_p4 = scmp.eq.s32.totalorder %s2558_s26, 1 }
   0xd   : > { %s2919_s30 = scalar_select %p157_p1, %s2823_s23, %s159_s28  }
   0xe   : > { %p2921_p5 = por %p170_p2, %p169_p0  ;;  %p2925_p6 = por %p176_p4, %p175_p3 }
   0xf   : > { %4628 = sst [smem:[#allocation12_spill]] %s2919_s30  ;;  %p2559_p7 = scmp.ge.s32.totalorder %s2827_s24, 1 }
  0x10   : > { %p183_p8 = scmp.lt.s32.totalorder %s2827_s24, 3  ;;  %p2606_p9 = scmp.eq.s32.totalorder %s2904_s25, 0 }
  0x11   : > { %s4632_s2 = sld [smem:[#allocation57_spill]]  ;;  %s2829_s13 = smov [#allocation5]  }
  0x12   : > { %p2932_p10 = pnand %p2559_p7, %p183_p8  ;;  %s210_s14 = sshll.u32 %s2829_s13, 4  ;;  %s211_s14 = int_to_ptr.vmem [resolvable:$true] %s210_s14 }
  0x13   : > { %s4634_s1 = sld [smem:[#allocation56_spill]]  ;;  %s2830_s19 = smov 128  }
  0x14   : > { %p2592_p11 = pneg %p2932_p10  ;;  %s2831_s20 = smov 8  }
  0x15   : > { %s2832_s26 = smov [#allocation2]   ;;  %s2833_s29 = smov 32  }
  0x16   : > { %p2943_p12 = pnand %p2606_p9, %p2592_p11  ;;  %s196_s28 = sshll.u32 %s2832_s26, 4  ;;  %s197_s28 = int_to_ptr.vmem [resolvable:$true] %s196_s28 }
  0x17   : > { %s208_s12 = sshll.u32 %s4632_s2, 4  ;;  %s2834_s10 = smov 2   ;;  %s209_s12 = int_to_ptr.hbm [resolvable:$true] %s208_s12 }
  0x18   : > { %2598 = dma.hbm_to_vmem [thread:$0]  (!%p2943_p12), %s209_s12, 512, %s211_s14, [#allocation6], %s2830_s19, %s2830_s19, %s2831_s20  }
  0x19   : > { %s194_s18 = sshll.u32 %s4634_s1, 4  ;;  %s225_s16 = sshll.u32 %s4556_s4, 4  ;;  %s195_s18 = int_to_ptr.hbm [resolvable:$true] %s194_s18  ;;  %s226_s16 = int_to_ptr.hbm [resolvable:$true] %s225_s16 }
  0x1a   : > { %2595 = dma.hbm_to_vmem [thread:$0]  (!%p2943_p12), %s195_s18, 288, %s197_s28, [#allocation3], %s2833_s29, %s2833_s29, %s2834_s10  }
  0x1b   : > { %s2835_s17 = smov [#allocation7]   ;;  %s2836_s2 = smov 256  }
  0x1c   : > { %s227_s1 = sshll.u32 %s2835_s17, 4  ;;  %s2837_s30 = smov 16   ;;  %s228_s1 = int_to_ptr.vmem [resolvable:$true] %s227_s1 }
  0x1d   : > { %2601 = dma.hbm_to_vmem [thread:$0]  (!%p2943_p12), %s226_s16, 512, %s228_s1, [#allocation6], %s2836_s2, %s2836_s2, %s2837_s30  }
  0x1e   : > { %254 = sbr.rel (%p2932_p10) target bundleno = 853 (0x355), region = 44 }
  0x23   : > { %2802 = dma.done.wait (%p2606_p9), [#allocation3], 288  }
  0x24   : > { %2804 = vsyncadd (%p2606_p9), [#allocation3], 4294967008 }
  0x25   : > { %2806 = dma.done.wait (%p2606_p9), [#allocation6], 1024  }
  0x26   : > { %2808 = vsyncadd (%p2606_p9), [#allocation6], 4294966272  ;;  %p295_p13 = scmp.lt.s32.totalorder %s2904_s25, 1  ;;  %s2838_s14 = smov 112   ;;  %v310_v3 = vlaneseq  ;;  %v395_v5 = vld [vmem:[#allocation2 + $0xc] sm:$0x3] }
  0x27   : > { %s2839_s15 = smov 111   ;;  %s2840_s18 = smov 113   ;;  %v3015_v9 = vperm.slane %v395_v5, 0  ;;  %v3019_v11 = vld [vmem:[#allocation2 + $0xe] sm:$0x3]  ;;  %v3090_v42 = vperm.slane %v395_v5, 1 }
  0x28   : > { %s296_s12 = scalar_select %p295_p13, %s2904_s25, 1  ;;  %v3010_v4 = vand.u32 127, %v310_v3  ;;  %v427_v12 = vld [vmem:[#allocation2 + $0x10] sm:$0x3]  ;;  %v3024_v14 = vperm.slane %v3019_v11, 0  ;;  %v302_v50 = vld [vmem:[#allocation5] sm:$0xff] }
  0x29   : > { %s2841_s19 = smov 127   ;;  %s2842_s20 = smov 1   ;;  %v3027_v15 = vperm.slane %v427_v12, 0  ;;  %v3038_v23 = vld [vmem:[#allocation2 + $0xa] sm:$0x3]  ;;  %4636 = vst [vmem:[#allocation14_spill] sm:$0xff] %v3090_v42 }
  0x2a   : > { %s2576_s1 = sshll.u32 %s296_s12, 4  ;;  %s2843_s26 = smov 15   ;;  %vm391_vm0 = vcmp.lt.s32.totalorder %v3010_v4, 113  ;;  %vm407_vm1 = vcmp.lt.s32.totalorder %v3010_v4, 112  ;;  %vm423_vm2 = vcmp.lt.s32.totalorder %v3010_v4, 111  ;;  %vm375_vm3 = vcmp.lt.s32.totalorder %v3010_v4, 127 }
  0x2b   : > { %s299_s9 = scalar_lea.vmem %s4552_s0, %s2576_s1  ;;  %s2844_s28 = smov 16   ;;  %4635 = vst [vmem:[#allocation13_spill] sm:$0xff] %v3027_v15  ;;  %v3059_v30 = vperm.slane %v3038_v23, 0  ;;  %v3088_v41 = vld [vmem:[#allocation2 + $0x6] sm:$0x3]  ;;  %v3094_v44 = vperm.slane %v427_v12, 1 }
  0x2c   : > { %v2974_v0 = vld [vmem:[%s299_s9] sm:$0xff]  ;;  %v2982_v1 = vld [vmem:[%s299_s9 + $0x8] sm:$0xff]  ;;  %s2845_s29 = smov 17   ;;  %vm459_vm4 = vcmask 588800   ;;  %vm359_vm5 = vcmp.lt.s32.totalorder %v3010_v4, 1  ;;  %v3112_v52 = vperm.slane %v3088_v41, 0 }
  0x2d   : > { %403 = vrot.lane.b32.xlu1 %v2974_v0, %s2838_s14  ;;  %419 = vrot.lane.b32.xlu0 %v2974_v0, %s2839_s15  ;;  %v3050_v28 = vand.u32 4294901760, %v2974_v0  ;;  %4637 = vst [vmem:[#allocation15_spill] sm:$0xff] %v3094_v44  ;;  %v3100_v46 = vld [vmem:[#allocation2 + $0x4] sm:$0x3]  ;;  %vm343_vm6 = vcmp.lt.s32.totalorder %v3010_v4, 15  ;;  %v3127_v59 = vperm.slane %v3019_v11, 1 }
  0x2e   : > { %387 = vrot.lane.b32.xlu2 %v2974_v0, %s2840_s18  ;;  %v3121_v56 = vperm.slane %v3100_v46, 0  ;;  %v461_v60 = vsel %vm459_vm4, %v302_v50, 0  ;;  %vm327_vm7 = vcmp.lt.s32.totalorder %v3010_v4, 16  ;;  %vm312_vm8 = vcmp.lt.s32.totalorder %v3010_v4, 17  ;;  %s2777_s30 = scalar_lea.hbm %s4558_s6, 64 }
  0x2f   : > { %v3080_v38 = vsub.f32 %v2974_v0, %v3050_v28  ;;  %4638 = vst [vmem:[#allocation16_spill] sm:$0xff] %v3127_v59  ;;  %v3152_v11 = vand.u32 4294901760, %v461_v60  ;;  %vm1306_vm9 = vcmask 130048  }
  0x31   : > { %v4560_v53 = vand.u32 4294901760, %v3080_v38 }
  0x35   : > { %405 = vrot.lane.b32.xlu1 %v2982_v1, %s2838_s14  ;;  %421 = vrot.lane.b32.xlu0 %v2982_v1, %s2839_s15 }
  0x36   : > { %389 = vrot.lane.b32.xlu2 %v2982_v1, %s2840_s18 }
  0x3d   : > { %373 = vrot.lane.b32.xlu1 %v2982_v1, %s2841_s19  ;;  %371 = vrot.lane.b32.xlu0 %v2974_v0, %s2841_s19 }
  0x3e   : > { %355 = vrot.lane.b32.xlu2 %v2974_v0, %s2842_s20 }
  0x45   : > { %339 = vrot.lane.b32.xlu1 %v2974_v0, %s2843_s26  ;;  %357 = vrot.lane.b32.xlu0 %v2982_v1, %s2842_s20 }
  0x46   : > { %341 = vrot.lane.b32.xlu2 %v2982_v1, %s2843_s26 }
  0x4d   : > { %325 = vrot.lane.b32.xlu1 %v2982_v1, %s2844_s28  ;;  %323 = vrot.lane.b32.xlu0 %v2974_v0, %s2844_s28 }
  0x4e   : > { %306 = vrot.lane.b32.xlu2 %v2974_v0, %s2845_s29 }
  0x55   : > { %308 = vrot.lane.b32.xlu0 %v2982_v1, %s2845_s29 }
  0x88   : > { %v388_v2 = vpop.permute.xlu2 %387 }
  0x90   : > { %v390_v6 = vpop.permute.xlu2 %389 }
  0x91   : > { %v392_v10 = vsel %vm391_vm0, %v388_v2, %v390_v6  ;;  %v393_v43 = vsel %vm391_vm0, %v390_v6, %v388_v2 }
  0x92   : > { %v401_v13 = vmul.f32 %v3015_v9, %v392_v10  ;;  %v402_v58 = vmul.f32 %v3090_v42, %v393_v43 }
  0x94   : > { %v3029_v16 = vand.u32 4294901760, %v401_v13 }
  0x96   : > { %v3047_v27 = vsub.f32 %v401_v13, %v3029_v16 }
  0x98   : > { %v3044_v26 = vpop.permute.xlu2 %355  ;;  %v4563_v35 = vand.u32 4294901760, %v3047_v27 }
  0x9a   : > { %v552_v49 = vsub.f32 %v3047_v27, %v4563_v35 }
  0x9c   : > { %v553_v2 = vand.u32 4294901760, %v552_v49 }
  0x9f   : > { %v3013_v7 = vpop.permute.xlu1 %403  ;;  %v420_v8 = vpop.permute.xlu0 %419 }
  0xa0   : > { %v3123_v57 = vpop.permute.xlu2 %341 }
  0xa7   : > { %v406_v17 = vpop.permute.xlu1 %405  ;;  %v422_v18 = vpop.permute.xlu0 %421 }
  0xa8   : > { %v408_v19 = vsel %vm407_vm1, %v3013_v7, %v406_v17  ;;  %v424_v20 = vsel %vm423_vm2, %v420_v8, %v422_v18  ;;  %v425_v51 = vsel %vm423_vm2, %v422_v18, %v420_v8  ;;  %v409_v61 = vsel %vm407_vm1, %v406_v17, %v3013_v7  ;;  %v331_v17 = vld [vmem:[#allocation2 + $0x2] sm:$0x3] }
  0xa9   : > { %v417_v21 = vmul.f32 %v3024_v14, %v408_v19  ;;  %v433_v22 = vmul.f32 %v3027_v15, %v424_v20  ;;  %v434_v62 = vmul.f32 %v3094_v44, %v425_v51  ;;  %v564_v7 = vsub.f32 %v3080_v38, %v4560_v53 }
  0xaa   : > { %v418_v12 = vmul.f32 %v3127_v59, %v409_v61  ;;  %v3160_v18 = vand.u32 4294901760, %v402_v58  ;;  %v3178_v43 = vperm.slane %v331_v17, 0  ;;  %v3253_v35 = vperm.slane %v331_v17, 1 }
  0xab   : > { %v3040_v24 = vand.u32 4294901760, %v417_v21  ;;  %v3042_v25 = vand.u32 4294901760, %v433_v22  ;;  %v3162_v19 = vand.u32 4294901760, %v434_v62 }
  0xac   : > { %4640 = vst [vmem:[#allocation18_spill] sm:$0xff] %v3178_v43  ;;  %v3186_v49 = vand.u32 4294901760, %v418_v12 }
  0xad   : > { %480 = vmatpush.msra.mxu0 %v3042_v25  ;;  %671 = vmatpush.msra.mxu3 %v3042_v25  ;;  %v3055_v29 = vsub.f32 %v433_v22, %v3042_v25  ;;  %v3062_v31 = vsub.f32 %v417_v21, %v3040_v24  ;;  %v3169_v22 = vperm.slane %v3038_v23, 1  ;;  %v3184_v23 = vsub.f32 %v461_v60, %v3152_v11 }
  0xae   : > { %4644 = vst [vmem:[#allocation22_spill] sm:$0xff] %v3253_v35 }
  0xaf   : > { %v3064_v32 = vpop.permute.xlu1 %373  ;;  %482 = vmatpush.msra.mxu0 %v3040_v24  ;;  %617 = vmatpush.msra.mxu2 %v3055_v29  ;;  %v3068_v33 = vpop.permute.xlu0 %371  ;;  %v4565_v34 = vand.u32 4294901760, %v3055_v29  ;;  %v4564_v37 = vand.u32 4294901760, %v3062_v31  ;;  %4639 = vst [vmem:[#allocation17_spill] sm:$0xff] %v3169_v22 }
  0xb0   : > { %673 = vmatpush.msra.mxu3 %v3040_v24  ;;  %v376_v36 = vsel %vm375_vm3, %v3068_v33, %v3064_v32 }
  0xb1   : > { %v385_v39 = vmul.f32 %v3059_v30, %v376_v36  ;;  %484 = vmatpush.msra.mxu0 %v3029_v16  ;;  %620 = vmatpush.msra.mxu2 %v3062_v31  ;;  %v540_v40 = vsub.f32 %v3055_v29, %v4565_v34  ;;  %v546_v45 = vsub.f32 %v3062_v31, %v4564_v37 }
  0xb2   : > { %675 = vmatpush.msra.mxu3 %v3029_v16 }
  0xb3   : > { %v3102_v47 = vand.u32 4294901760, %v385_v39  ;;  %623 = vmatpush.msra.mxu2 %v3047_v27  ;;  %v541_v48 = vand.u32 4294901760, %v540_v40  ;;  %v547_v54 = vand.u32 4294901760, %v546_v45  ;;  %v377_v40 = vsel %vm375_vm3, %v3064_v32, %v3068_v33 }
  0xb4   : > { %v3192_v32 = vsub.f32 %v402_v58, %v3160_v18  ;;  %v3195_v33 = vsub.f32 %v434_v62, %v3162_v19  ;;  %v386_v61 = vmul.f32 %v3169_v22, %v377_v40 }
  0xb5   : > { %486 = vmatpush.msra.mxu0 %v3102_v47  ;;  %542 = vmatpush.msra.mxu1 %v541_v48  ;;  %v3117_v55 = vsub.f32 %v385_v39, %v3102_v47  ;;  %v565_v39 = vand.u32 4294901760, %v564_v7  ;;  %v303_v48 = vld [vmem:[#allocation5 + $0x8] sm:$0xff] }
  0xb6   : > { %677 = vmatpush.msra.mxu3 %v3102_v47  ;;  %v464_v62 = vsel %vm459_vm4, %v303_v48, 0  ;;  %v4570_v53 = vand.u32 4294901760, %v3195_v33 }
  0xb7   : > { %v3135_v63 = vpop.permute.xlu1 %339  ;;  %548 = vmatpush.msra.mxu1 %v547_v54  ;;  %626 = vmatpush.msra.mxu2 %v3117_v55  ;;  %v358_v0 = vpop.permute.xlu0 %357  ;;  %v4562_v3 = vand.u32 4294901760, %v3117_v55 }
  0xb8   : > { %v361_v5 = vsel %vm359_vm5, %v358_v0, %v3044_v26  ;;  %v345_v6 = vsel %vm343_vm6, %v3123_v57, %v3135_v63  ;;  %488 = vmatpush.msra.mxu0 %v3050_v28  ;;  %679 = vmatpush.msra.mxu3 %v3050_v28 }
  0xb9   : > { %v369_v8 = vmul.f32 %v3112_v52, %v361_v5  ;;  %v353_v10 = vmul.f32 %v3121_v56, %v345_v6  ;;  %554 = vmatpush.msra.mxu1 %v553_v2  ;;  %v558_v13 = vsub.f32 %v3117_v55, %v4562_v3  ;;  %629 = vmatpush.msra.mxu2 %v3080_v38  ;;  %v3207_v5 = vperm.slane %v3088_v41, 1 }
  0xba   : > { %v3250_v3 = vand.u32 4294901760, %v2982_v1 }
  0xbb   : > { %v3164_v20 = vand.u32 4294901760, %v369_v8  ;;  %v3166_v21 = vand.u32 4294901760, %v353_v10  ;;  %v559_v36 = vand.u32 4294901760, %v558_v13  ;;  %4641 = vst [vmem:[#allocation19_spill] sm:$0xff] %v3207_v5  ;;  %v3218_v13 = vsub.f32 %v418_v12, %v3186_v49 }
  0xbc   : > { %v3234_v12 = vand.u32 4294901760, %v386_v61 }
  0xbd   : > { %490 = vmatpush.msra.mxu0 %v3164_v20  ;;  %681 = vmatpush.msra.mxu3 %v3164_v20  ;;  %v3181_v45 = vsub.f32 %v369_v8, %v3164_v20  ;;  %v3189_v50 = vsub.f32 %v353_v10, %v3166_v21  ;;  %v315_v8 = vld [vmem:[#allocation2] sm:$0x3]  ;;  %v3215_v10 = vand.u32 4294901760, %v3184_v23 }
  0xbe   : > { %560 = vmatpush.msra.mxu1 %v559_v36  ;;  %v3221_v36 = vperm.slane %v3100_v46, 1 }
  0xbf   : > { %v326_v51 = vpop.permute.xlu1 %325  ;;  %v324_v54 = vpop.permute.xlu0 %323  ;;  %632 = vmatpush.msra.mxu2 %v3181_v45  ;;  %492 = vmatpush.msra.mxu0 %v3166_v21  ;;  %v4559_v60 = vand.u32 4294901760, %v3181_v45  ;;  %v4561_v58 = vand.u32 4294901760, %v3189_v50 }
  0xc0   : > { %v329_v2 = vsel %vm327_vm7, %v326_v51, %v324_v54  ;;  %566 = vmatpush.msra.mxu1 %v565_v39  ;;  %683 = vmatpush.msra.mxu3 %v3166_v21  ;;  %4642 = vst [vmem:[#allocation20_spill] sm:$0xff] %v3221_v36  ;;  %v360_v39 = vsel %vm359_vm5, %v3044_v26, %v358_v0  ;;  %v307_v26 = vpop.permute.xlu2 %306 }
  0xc1   : > { %v337_v6 = vmul.f32 %v3178_v43, %v329_v2  ;;  %635 = vmatpush.msra.mxu2 %v3189_v50  ;;  %v570_v7 = vsub.f32 %v3181_v45, %v4559_v60  ;;  %v576_v41 = vsub.f32 %v3189_v50, %v4561_v58  ;;  %v3232_v2 = vand.u32 4294901760, %v464_v62 }
  0xc2   : > { %v3236_v60 = vperm.slane %v315_v8, 0  ;;  %v344_v58 = vsel %vm343_vm6, %v3135_v63, %v3123_v57  ;;  %v3256_v57 = vperm.slane %v315_v8, 1  ;;  %v3268_v8 = vsub.f32 %v386_v61, %v3234_v12 }
  0xc3   : > { %v3230_v40 = vand.u32 4294901760, %v337_v6  ;;  %v571_v48 = vand.u32 4294901760, %v570_v7  ;;  %v577_v46 = vand.u32 4294901760, %v576_v41  ;;  %v500_v7 = vsub.f32 %v3184_v23, %v3215_v10 }
  0xc4   : > { %4643 = vst [vmem:[#allocation21_spill] sm:$0xff] %v3236_v60  ;;  %v370_v41 = vmul.f32 %v3207_v5, %v360_v39  ;;  %v3265_v17 = vsub.f32 %v464_v62, %v3232_v2  ;;  %v304_v39 = vld [vmem:[#allocation5 + $0x10] sm:$0xff]  ;;  %v354_v63 = vmul.f32 %v3221_v36, %v344_v58  ;;  %v3284_v61 = vsub.f32 %v2982_v1, %v3250_v3 }
  0xc5   : > { %494 = vmatpush.msra.mxu0 %v3230_v40  ;;  %572 = vmatpush.msra.mxu1 %v571_v48  ;;  %v3245_v0 = vsub.f32 %v337_v6, %v3230_v40  ;;  %4645 = vst [vmem:[#allocation23_spill] sm:$0xff] %v3256_v57  ;;  %v328_v6 = vsel %vm327_vm7, %v324_v54, %v326_v51  ;;  %v3280_v34 = vand.u32 4294901760, %v500_v7  ;;  %v4646_v1 = vand.u32 4294901760, %v3218_v13 }
  0xc6   : > { %685 = vmatpush.msra.mxu3 %v3230_v40  ;;  %v883_v54 = vsub.f32 %v3195_v33, %v4570_v53  ;;  %v3286_v58 = vand.u32 4294901760, %v370_v41  ;;  %v338_v44 = vmul.f32 %v3253_v35, %v328_v6  ;;  %v467_v53 = vsel %vm459_vm4, %v304_v39, 0 }
  0xc7   : > { %v309_v48 = vpop.permute.xlu0 %308  ;;  %578 = vmatpush.msra.mxu1 %v577_v46  ;;  %638 = vmatpush.msra.mxu2 %v3245_v0  ;;  %v4573_v37 = vand.u32 4294901760, %v3245_v0  ;;  %v3297_v7 = vand.u32 4294901760, %v354_v63  ;;  %v889_v42 = vsub.f32 %v3218_v13, %v4646_v1  ;;  %v3309_v39 = vand.u32 4294901760, %v467_v53 }
  0xc8   : > { %v314_v51 = vsel %vm312_vm8, %v309_v48, %v307_v26  ;;  %v313_v36 = vsel %vm312_vm8, %v307_v26, %v309_v48  ;;  %v884_v22 = vand.u32 4294901760, %v883_v54  ;;  %v3312_v54 = vsub.f32 %v370_v41, %v3286_v58 }
  0xc9   : > { %v321_v46 = vmul.f32 %v3236_v60, %v314_v51  ;;  %v582_v62 = vsub.f32 %v3245_v0, %v4573_v37  ;;  %v3295_v37 = vand.u32 4294901760, %v3265_v17  ;;  %v322_v35 = vmul.f32 %v3256_v57, %v313_v36 }
  0xca   : > { %v4647_v36 = vand.u32 4294901760, %v3192_v32  ;;  %v3327_v48 = vsub.f32 %v354_v63, %v3297_v7  ;;  %v890_v6 = vand.u32 4294901760, %v889_v42  ;;  %v4649_v57 = vand.u32 4294901760, %v3268_v8 }
  0xcb   : > { %v3292_v51 = vand.u32 4294901760, %v321_v46  ;;  %v583_v5 = vand.u32 4294901760, %v582_v62  ;;  %v3314_v62 = vand.u32 4294901760, %v338_v44  ;;  %v508_v41 = vsub.f32 %v3265_v17, %v3295_v37 }
  0xcc   : > { %v3346_v59 = vsub.f32 %v467_v53, %v3309_v39  ;;  %v4652_v60 = vand.u32 4294901760, %v3047_v27  ;;  %v918_v53 = vand.u32 4294901760, %v3327_v48 }
  0xcd   : > { %496 = vmatpush.msra.mxu0 %v3292_v51  ;;  %584 = vmatpush.msra.mxu1 %v583_v5  ;;  %v3306_v26 = vsub.f32 %v321_v46, %v3292_v51  ;;  %v895_v5 = vsub.f32 %v3192_v32, %v4647_v36  ;;  %v4648_v46 = vand.u32 4294901760, %v3055_v29  ;;  %v901_v36 = vsub.f32 %v3268_v8, %v4649_v57 }
  0xce   : > { %687 = vmatpush.msra.mxu3 %v3292_v51  ;;  %502 = vmatmul.f32.vlgmr.msra.gmra.mxu0 %v3280_v34  ;;  %v3334_v29 = vand.u32 4294901760, %v322_v35  ;;  %v3349_v57 = vsub.f32 %v338_v44, %v3314_v62  ;;  %v3355_v43 = vand.u32 4294901760, %v508_v41 }
  0xcf   : > { %723 = vmatpush.msrb.mxu0 %v4648_v46  ;;  %v4588_v1 = vand.u32 4294901760, %v3306_v26  ;;  %641 = vmatpush.msra.mxu2 %v3306_v26  ;;  %v4651_v46 = vand.u32 4294901760, %v3284_v61  ;;  %v896_v15 = vand.u32 4294901760, %v895_v5  ;;  %v902_v44 = vand.u32 4294901760, %v901_v36 }
  0xd0   : > { %885 = vmatpush.msrb.mxu3 %v884_v22  ;;  %644 = vmatmul.f32.vlgmr.msra.gmra.mxu2 %v3184_v23  ;;  %v4650_v22 = vand.u32 4294901760, %v3062_v31  ;;  %v912_v31 = vand.u32 4294901760, %v3312_v54  ;;  %v4653_v5 = vand.u32 4294901760, %v3117_v55  ;;  %v4654_v55 = vand.u32 4294901760, %v3080_v38 }
  0xd1   : > { %691 = vmatmul.f32.vlgmr.msra.gmra.mxu3 %v3215_v10  ;;  %v588_v63 = vsub.f32 %v3306_v26, %v4588_v1  ;;  %v907_v42 = vsub.f32 %v3284_v61, %v4651_v46  ;;  %823 = vmatpush.msrb.mxu2 %v3162_v19  ;;  %v2846_v46 = vmov 0   ;;  %v4655_v38 = vand.u32 4294901760, %v3181_v45 }
  0xd2   : > { %727 = vmatpush.msrb.mxu0 %v4650_v22  ;;  %891 = vmatpush.msrb.mxu3 %v890_v6  ;;  %v305_v22 = vld [vmem:[#allocation5 + $0x18] sm:$0xff]  ;;  %v3361_v6 = vsub.f32 %v322_v35, %v3334_v29  ;;  %v924_v35 = vand.u32 4294901760, %v3349_v57 }
  0xd3   : > { %v589_v1 = vand.u32 4294901760, %v588_v63  ;;  %2664 = vset.pattern.permute.xlu1 %v2846_v46  ;;  %825 = vmatpush.msrb.mxu2 %v3186_v49  ;;  %v908_v27 = vand.u32 4294901760, %v907_v42  ;;  %v470_v41 = vsel %vm459_vm4, %v305_v22, 0 }
  0xd4   : > { %731 = vmatpush.msrb.mxu0 %v4652_v60  ;;  %897 = vmatpush.msrb.mxu3 %v896_v15  ;;  %v3366_v60 = vand.u32 4294901760, %v3346_v59  ;;  %v913_v15 = vsub.f32 %v3312_v54, %v912_v31  ;;  %v3382_v36 = vand.u32 4294901760, %v470_v41  ;;  %v930_v42 = vand.u32 4294901760, %v3361_v6 }
  0xd5   : > { %590 = vmatpush.msra.mxu1 %v589_v1  ;;  %827 = vmatpush.msrb.mxu2 %v3160_v18  ;;  %v919_v1 = vsub.f32 %v3327_v48, %v918_v53  ;;  %v925_v22 = vsub.f32 %v3349_v57, %v924_v35 }
  0xd6   : > { %735 = vmatpush.msrb.mxu0 %v4653_v5  ;;  %903 = vmatpush.msrb.mxu3 %v902_v44  ;;  %v516_v63 = vsub.f32 %v3346_v59, %v3366_v60  ;;  %v4656_v44 = vand.u32 4294901760, %v3189_v50  ;;  %v4657_v50 = vand.u32 4294901760, %v3245_v0 }
  0xd7   : > { %510 = vmatmul.f32.gmra.mxu0 %v3355_v43  ;;  %592 = vmatmul.f32.vlgmr.msra.gmra.mxu1 %v3152_v11  ;;  %v920_v5 = vand.u32 4294901760, %v919_v1 }
  0xd8   : > { %739 = vmatpush.msrb.mxu0 %v4654_v55  ;;  %781 = vmatpush.msrb.mxu1 %v3042_v25  ;;  %v914_v25 = vand.u32 4294901760, %v913_v15  ;;  %v3403_v45 = vand.u32 4294901760, %v516_v63  ;;  %v926_v15 = vand.u32 4294901760, %v925_v22  ;;  %v4658_v55 = vand.u32 4294901760, %v3306_v26 }
  0xd9   : > { %829 = vmatpush.msrb.mxu2 %v3234_v12  ;;  %909 = vmatpush.msrb.mxu3 %v908_v27  ;;  %v3399_v27 = vsub.f32 %v470_v41, %v3382_v36  ;;  %v4660_v26 = vand.u32 4294901760, %v3218_v13 }
  0xda   : > { %649 = vmatmul.f32.gmra.mxu2 %v3265_v17  ;;  %743 = vmatpush.msrb.mxu0 %v4655_v38 }
  0xdb   : > { %783 = vmatpush.msrb.mxu1 %v3040_v24  ;;  %831 = vmatpush.msrb.mxu2 %v3250_v3  ;;  %v931_v24 = vsub.f32 %v3361_v6, %v930_v42 }
  0xdc   : > { %915 = vmatpush.msrb.mxu3 %v914_v25  ;;  %747 = vmatpush.msrb.mxu0 %v4656_v44 }
  0xdd   : > { %697 = vmatmul.f32.gmra.mxu3 %v3295_v37  ;;  %785 = vmatpush.msrb.mxu1 %v3029_v16  ;;  %v3414_v16 = vand.u32 4294901760, %v3399_v27  ;;  %v932_v41 = vand.u32 4294901760, %v931_v24 }
  0xde   : > { %833 = vmatpush.msrb.mxu2 %v3286_v58  ;;  %921 = vmatpush.msrb.mxu3 %v920_v5 }
  0xdf   : > { %751 = vmatpush.msrb.mxu0 %v4657_v50  ;;  %787 = vmatpush.msrb.mxu1 %v3102_v47  ;;  %v524_v47 = vsub.f32 %v3399_v27, %v3414_v16 }
  0xe0   : > { %835 = vmatpush.msrb.mxu2 %v3297_v7  ;;  %927 = vmatpush.msrb.mxu3 %v926_v15 }
  0xe1   : > { %518 = vmatmul.f32.gmra.mxu0 %v3403_v45  ;;  %596 = vmatmul.f32.gmra.mxu1 %v3232_v2  ;;  %v525_v0 = vand.u32 4294901760, %v524_v47 }
  0xe2   : > { %755 = vmatpush.msrb.mxu0 %v4658_v55  ;;  %789 = vmatpush.msrb.mxu1 %v3050_v28  ;;  %v4659_v28 = vand.u32 4294901760, %v3195_v33 }
  0xe3   : > { %837 = vmatpush.msrb.mxu2 %v3314_v62  ;;  %933 = vmatpush.msrb.mxu3 %v932_v41 }
  0xe4   : > { %960 = vmatpush.msra.mxu0 %v3195_v33  ;;  %654 = vmatmul.f32.gmra.mxu2 %v3346_v59  ;;  %v4661_v33 = vand.u32 4294901760, %v3192_v32 }
  0xe5   : > { %1124 = vmatpush.msra.mxu3 %v3162_v19  ;;  %791 = vmatpush.msrb.mxu1 %v3164_v20  ;;  %v436_v20 = vld [vmem:[%s4555_s3 + $0x8] sm:$0xff] }
  0xe6   : > { %839 = vmatpush.msrb.mxu2 %v3334_v29  ;;  %963 = vmatpush.msra.mxu0 %v3218_v13 }
  0xe7   : > { %1126 = vmatpush.msra.mxu3 %v3186_v49  ;;  %793 = vmatpush.msrb.mxu1 %v3166_v21  ;;  %v4662_v21 = vand.u32 4294901760, %v3268_v8 }
  0xe8   : > { %1066 = vmatpush.msra.mxu2 %v4659_v28  ;;  %703 = vmatmul.f32.gmra.mxu3 %v3366_v60 }
  0xe9   : > { %966 = vmatpush.msra.mxu0 %v3192_v32  ;;  %1128 = vmatpush.msra.mxu3 %v3160_v18  ;;  %v4663_v32 = vand.u32 4294901760, %v3284_v61 }
  0xea   : > { %1070 = vmatpush.msra.mxu2 %v4660_v26  ;;  %795 = vmatpush.msrb.mxu1 %v3230_v40 }
  0xeb   : > { %969 = vmatpush.msra.mxu0 %v3268_v8  ;;  %1130 = vmatpush.msra.mxu3 %v3234_v12 }
  0xec   : > { %1074 = vmatpush.msra.mxu2 %v4661_v33  ;;  %526 = vmatmul.f32.gmra.mxu0 %v525_v0 }
  0xed   : > { %600 = vmatmul.f32.gmra.mxu1 %v3309_v39  ;;  %446 = vperm.xlu1 %2664, %v436_v20  }
  0xee   : > { %797 = vmatpush.msrb.mxu1 %v3292_v51  ;;  %972 = vmatpush.msra.mxu0 %v3284_v61 }
  0xef   : > { %1078 = vmatpush.msra.mxu2 %v4662_v21  ;;  %1132 = vmatpush.msra.mxu3 %v3250_v3 }
  0xf0   : > { %1014 = vmatpush.msra.mxu1 %v3162_v19  ;;  %659 = vmatmul.f32.gmra.mxu2 %v3399_v27 }
  0xf1   : > { %975 = vmatpush.msra.mxu0 %v3312_v54  ;;  %1082 = vmatpush.msra.mxu2 %v4663_v32 }
  0xf2   : > { %1016 = vmatpush.msra.mxu1 %v3186_v49  ;;  %1134 = vmatpush.msra.mxu3 %v3286_v58 }
  0xf3   : > { %709 = vmatmul.f32.gmra.mxu3 %v3414_v16  ;;  %978 = vmatpush.msra.mxu0 %v3327_v48 }
  0xf4   : > { %1018 = vmatpush.msra.mxu1 %v3160_v18  ;;  %1086 = vmatpush.msra.mxu2 %v912_v31  ;;  %v435_v18 = vld [vmem:[%s4555_s3] sm:$0xff] }
  0xf5   : > { %1136 = vmatpush.msra.mxu3 %v3297_v7  ;;  %981 = vmatpush.msra.mxu0 %v3349_v57 }
  0xf6   : > { %1020 = vmatpush.msra.mxu1 %v3234_v12  ;;  %1090 = vmatpush.msra.mxu2 %v918_v53 }
  0xf7   : > { %1138 = vmatpush.msra.mxu3 %v3314_v62  ;;  %604 = vmatmul.f32.gmra.mxu1 %v3382_v36 }
  0xf8   : > { %757 = vmatmul.f32.vlgmr.msrb.gmra.mxu0 %v3152_v11  ;;  %1022 = vmatpush.msra.mxu1 %v3250_v3 }
  0xf9   : > { %984 = vmatpush.msra.mxu0 %v3361_v6  ;;  %1094 = vmatpush.msra.mxu2 %v924_v35 }
  0xfa   : > { %1140 = vmatpush.msra.mxu3 %v3334_v29  ;;  %845 = vmatmul.f32.vlgmr.msrb.gmra.mxu2 %v3280_v34 }
  0xfb   : > { %1024 = vmatpush.msra.mxu1 %v3286_v58  ;;  %1098 = vmatpush.msra.mxu2 %v930_v42 }
  0xfc   : > { %935 = vmatmul.f32.vlgmr.msrb.gmra.mxu3 %v3152_v11  ;;  %2665 = vset.pattern.permute.xlu2 %v2846_v46 }
  0xfd   : > { %1026 = vmatpush.msra.mxu1 %v3297_v7  ;;  %441 = vperm.xlu2 %2665, %v435_v18  }
  0xfe   : > { %2666 = vset.pattern.permute.xlu0 %v2846_v46 }
  0xff   : > { %1028 = vmatpush.msra.mxu1 %v3314_v62 }
 0x100   : > { %761 = vmatmul.f32.gmra.mxu0 %v3232_v2  ;;  %799 = vmatmul.f32.vlgmr.msrb.gmra.mxu1 %v3152_v11 }
 0x101   : > { %1030 = vmatpush.msra.mxu1 %v3334_v29 }
 0x102   : > { %853 = vmatmul.f32.gmra.mxu2 %v3355_v43 }
 0x104   : > { %939 = vmatmul.f32.gmra.mxu3 %v3232_v2 }
 0x108   : > { %765 = vmatmul.f32.gmra.mxu0 %v3309_v39  ;;  %803 = vmatmul.f32.gmra.mxu1 %v3232_v2 }
 0x10a   : > { %861 = vmatmul.f32.gmra.mxu2 %v3403_v45 }
 0x10c   : > { %943 = vmatmul.f32.gmra.mxu3 %v3309_v39 }
 0x110   : > { %769 = vmatmul.f32.gmra.mxu0 %v3382_v36  ;;  %807 = vmatmul.f32.gmra.mxu1 %v3309_v39 }
 0x112   : > { %869 = vmatmul.f32.gmra.mxu2 %v525_v0 }
 0x114   : > { %947 = vmatmul.f32.gmra.mxu3 %v3382_v36 }
 0x118   : > { %811 = vmatmul.f32.gmra.mxu1 %v3382_v36  ;;  %987 = vmatmul.f32.vlgmr.msra.gmra.mxu0 %v3184_v23 }
 0x11a   : > { %1100 = vmatmul.f32.vlgmr.msra.gmra.mxu2 %v3152_v11 }
 0x11c   : > { %1142 = vmatmul.f32.vlgmr.msra.gmra.mxu3 %v3152_v11 }
 0x120   : > { %992 = vmatmul.f32.gmra.mxu0 %v3265_v17  ;;  %1034 = vmatmul.f32.vlgmr.msra.gmra.mxu1 %v3215_v10 }
 0x122   : > { %1104 = vmatmul.f32.gmra.mxu2 %v3232_v2 }
 0x124   : > { %1146 = vmatmul.f32.gmra.mxu3 %v3232_v2 }
 0x128   : > { %1040 = vmatmul.f32.gmra.mxu1 %v3295_v37  ;;  %997 = vmatmul.f32.gmra.mxu0 %v3346_v59 }
 0x12a   : > { %1108 = vmatmul.f32.gmra.mxu2 %v3309_v39 }
 0x12c   : > { %1150 = vmatmul.f32.gmra.mxu3 %v3309_v39 }
 0x130   : > { %1046 = vmatmul.f32.gmra.mxu1 %v3366_v60  ;;  %1002 = vmatmul.f32.gmra.mxu0 %v3399_v27 }
 0x132   : > { %1112 = vmatmul.f32.gmra.mxu2 %v3382_v36 }
 0x134   : > { %1154 = vmatmul.f32.gmra.mxu3 %v3382_v36 }
 0x138   : > { %1052 = vmatmul.f32.gmra.mxu1 %v3414_v16 }
 0x14b   : > { %v503_v34 = vpop.f32.mrf.mxu0 }
 0x153   : > { %v645_v11 = vpop.f32.mrf.mxu2 }
 0x154   : > { %v593_v3 = vpop.f32.mrf.mxu1  ;;  %v511_v37 = vpop.f32.mrf.mxu0 }
 0x155   : > { %v692_v19 = vpop.f32.mrf.mxu3 }
 0x157   : > { %v442_v40 = vpop.permute.xlu2 %441 }
 0x158   : > { %v504_v17 = vadd.f32 %v503_v34, %v442_v40 }
 0x15a   : > { %v594_v8 = vadd.f32 %v593_v3, %v504_v17 }
 0x15c   : > { %v646_v48 = vadd.f32 %v645_v11, %v594_v8 }
 0x15d   : > { %v650_v43 = vpop.f32.mrf.mxu2 }
 0x15e   : > { %v597_v59 = vpop.f32.mrf.mxu1  ;;  %v3519_v23 = vpop.f32.mrf.mxu0  ;;  %v693_v62 = vadd.f32 %v692_v19, %v646_v48  ;;  %v437_v48 = vld [vmem:[%s4555_s3 + $0x10] sm:$0xff] }
 0x15f   : > { %4664 = vst [vmem:[#allocation24_spill] sm:$0xff] %v3519_v23  ;;  %v447_v61 = vpop.permute.xlu1 %446  ;;  %v1164_v23 = vld [vmem:[#allocation7 + $0x10] sm:$0xff] }
 0x160   : > { %v698_v49 = vpop.f32.mrf.mxu3  ;;  %v512_v39 = vadd.f32 %v511_v37, %v447_v61 }
 0x162   : > { %v598_v29 = vadd.f32 %v597_v59, %v512_v39  ;;  %v438_v39 = vld [vmem:[%s4555_s3 + $0x18] sm:$0xff] }
 0x164   : > { %v651_v53 = vadd.f32 %v650_v43, %v598_v29 }
 0x166   : > { %v699_v36 = vadd.f32 %v698_v49, %v651_v53 }
 0x167   : > { %v3523_v13 = vpop.f32.mrf.mxu2 }
 0x168   : > { %4666 = vst [vmem:[#allocation26_spill] sm:$0xff] %v3523_v13 }
 0x169   : > { %v3525_v2 = vpop.f32.mrf.mxu0 }
 0x16a   : > { %v3521_v10 = vpop.f32.mrf.mxu1  ;;  %4667 = vst [vmem:[#allocation27_spill] sm:$0xff] %v3525_v2  ;;  %v4692_v2 = vld [vmem:[#allocation18_spill] sm:$0xff] }
 0x16b   : > { %4665 = vst [vmem:[#allocation25_spill] sm:$0xff] %v3521_v10  ;;  %v3527_v12 = vpop.f32.mrf.mxu3 }
 0x16c   : > { %4668 = vst [vmem:[#allocation28_spill] sm:$0xff] %v3527_v12 }
 0x173   : > { %v3531_v51 = vpop.f32.mrf.mxu2 }
 0x174   : > { %v3529_v58 = vpop.f32.mrf.mxu1  ;;  %4670 = vst [vmem:[#allocation30_spill] sm:$0xff] %v3531_v51 }
 0x175   : > { %4669 = vst [vmem:[#allocation29_spill] sm:$0xff] %v3529_v58  ;;  %v758_v7 = vpop.f32.mrf.mxu0 }
 0x176   : > { %v3533_v54 = vpop.f32.mrf.mxu3  ;;  %v759_v57 = vadd.f32 %v758_v7, %v693_v62  ;;  %v1294_v7 = vld [vmem:[%s4557_s5] sm:$0xff] }
 0x177   : > { %4671 = vst [vmem:[#allocation31_spill] sm:$0xff] %v3533_v54 }
 0x17d   : > { %v762_v31 = vpop.f32.mrf.mxu0  ;;  %v800_v46 = vpop.f32.mrf.mxu1 }
 0x17e   : > { %v801_v6 = vadd.f32 %v800_v46, %v759_v57  ;;  %v846_v60 = vpop.f32.mrf.mxu2  ;;  %v763_v63 = vadd.f32 %v762_v31, %v699_v36 }
 0x17f   : > { %v936_v35 = vpop.f32.mrf.mxu3  ;;  %v847_v16 = vadd.f32 %v846_v60, %v442_v40 }
 0x180   : > { %v3535_v1 = vmax.f32 %v801_v6, 0.0 }
 0x181   : > { %v937_v28 = vadd.f32 %v936_v35, %v847_v16 }
 0x182   : > { %1230 = vrot.lane.b32.xlu1 %v3535_v1, %s2841_s19  ;;  %1246 = vrot.lane.b32.xlu0 %v3535_v1, %s2840_s18 }
 0x183   : > { %1262 = vrot.lane.b32.xlu2 %v3535_v1, %s2838_s14 }
 0x185   : > { %v3543_v42 = vpop.f32.mrf.mxu0  ;;  %v804_v38 = vpop.f32.mrf.mxu1 }
 0x186   : > { %4672 = vst [vmem:[#allocation32_spill] sm:$0xff] %v3543_v42  ;;  %v805_v25 = vadd.f32 %v804_v38, %v763_v63  ;;  %v854_v22 = vpop.f32.mrf.mxu2 }
 0x187   : > { %v940_v44 = vpop.f32.mrf.mxu3  ;;  %v855_v20 = vadd.f32 %v854_v22, %v447_v61 }
 0x188   : > { %v3545_v5 = vmax.f32 %v805_v25, 0.0 }
 0x189   : > { %v941_v3 = vadd.f32 %v940_v44, %v855_v20 }
 0x18a   : > { %1248 = vrot.lane.b32.xlu1 %v3545_v5, %s2840_s18  ;;  %1198 = vrot.lane.b32.xlu0 %v3535_v1, %s2843_s26 }
 0x18b   : > { %1214 = vrot.lane.b32.xlu2 %v3535_v1, %s2842_s20 }
 0x18d   : > { %v3553_v27 = vpop.f32.mrf.mxu0  ;;  %v3555_v45 = vpop.f32.mrf.mxu1 }
 0x18e   : > { %4673 = vst [vmem:[#allocation33_spill] sm:$0xff] %v3553_v27  ;;  %v3557_v24 = vpop.f32.mrf.mxu2 }
 0x18f   : > { %4674 = vst [vmem:[#allocation34_spill] sm:$0xff] %v3555_v45  ;;  %v3559_v15 = vpop.f32.mrf.mxu3 }
 0x192   : > { %1200 = vrot.lane.b32.xlu1 %v3545_v5, %s2843_s26  ;;  %1264 = vrot.lane.b32.xlu0 %v3545_v5, %s2838_s14 }
 0x193   : > { %1232 = vrot.lane.b32.xlu2 %v3545_v5, %s2841_s19 }
 0x195   : > { %v3567_v50 = vpop.f32.mrf.mxu1  ;;  %v988_v55 = vpop.f32.mrf.mxu0 }
 0x196   : > { %4675 = vst [vmem:[#allocation35_spill] sm:$0xff] %v3567_v50  ;;  %v3569_v41 = vpop.f32.mrf.mxu2  ;;  %v989_v0 = vadd.f32 %v988_v55, %v937_v28 }
 0x197   : > { %4676 = vst [vmem:[#allocation36_spill] sm:$0xff] %v3569_v41  ;;  %v3571_v47 = vpop.f32.mrf.mxu3 }
 0x198   : > { %4677 = vst [vmem:[#allocation37_spill] sm:$0xff] %v3571_v47 }
 0x19a   : > { %1216 = vrot.lane.b32.xlu0 %v3545_v5, %s2842_s20 }
 0x19d   : > { %v1035_v26 = vpop.f32.mrf.mxu1  ;;  %v993_v34 = vpop.f32.mrf.mxu0 }
 0x19e   : > { %v1036_v33 = vadd.f32 %v1035_v26, %v989_v0  ;;  %v1101_v21 = vpop.f32.mrf.mxu2  ;;  %v994_v37 = vadd.f32 %v993_v34, %v941_v3 }
 0x19f   : > { %v1143_v32 = vpop.f32.mrf.mxu3 }
 0x1a0   : > { %v1102_v18 = vadd.f32 %v1101_v21, %v1036_v33 }
 0x1a2   : > { %v1144_v11 = vadd.f32 %v1143_v32, %v1102_v18 }
 0x1a4   : > { %v3575_v19 = vmax.f32 %v1144_v11, 0.0 }
 0x1a5   : > { %v1041_v59 = vpop.f32.mrf.mxu1 }
 0x1a6   : > { %v1042_v43 = vadd.f32 %v1041_v59, %v994_v37  ;;  %1250 = vrot.lane.b32.xlu1 %v3575_v19, %s2840_s18  ;;  %1266 = vrot.lane.b32.xlu0 %v3575_v19, %s2838_s14  ;;  %v1105_v49 = vpop.f32.mrf.mxu2 }
 0x1a7   : > { %1234 = vrot.lane.b32.xlu2 %v3575_v19, %s2841_s19  ;;  %v1147_v40 = vpop.f32.mrf.mxu3 }
 0x1a8   : > { %v1106_v17 = vadd.f32 %v1105_v49, %v1042_v43 }
 0x1aa   : > { %v1148_v8 = vadd.f32 %v1147_v40, %v1106_v17 }
 0x1ac   : > { %v3583_v61 = vmax.f32 %v1148_v8, 0.0 }
 0x1ae   : > { %1268 = vrot.lane.b32.xlu1 %v3583_v61, %s2838_s14  ;;  %1218 = vrot.lane.b32.xlu0 %v3575_v19, %s2842_s20 }
 0x1af   : > { %1252 = vrot.lane.b32.xlu2 %v3583_v61, %s2840_s18  ;;  %s292_s18 = sand.u32 1, %s2819_s22  }
 0x1b6   : > { %1202 = vrot.lane.b32.xlu1 %v3575_v19, %s2843_s26  ;;  %1236 = vrot.lane.b32.xlu0 %v3583_v61, %s2841_s19  ;;  %s2568_s19 = sshll.u32 %s292_s18, 5 }
 0x1b7   : > { %1184 = vrot.lane.b32.xlu2 %v3545_v5, %s2844_s28 }
 0x1be   : > { %1220 = vrot.lane.b32.xlu1 %v3583_v61, %s2842_s20  ;;  %1168 = vrot.lane.b32.xlu0 %v3545_v5, %s2845_s29  ;;  %s4499_s20 = scalar_lea.vmem [#allocation8], %s2568_s19 }
 0x1bf   : > { %1204 = vrot.lane.b32.xlu2 %v3583_v61, %s2843_s26  ;;  %s2577_s26 = sshll.u32 %s2904_s25, 5  ;;  %s2462_s13 = sshll.u32 %s4499_s20, 4  ;;  %s2463_s13 = int_to_ptr.vmem [resolvable:$true] %s2462_s13 }
 0x1c0   : > { %s2461_s11 = scalar_lea.hbm %s4558_s6, %s2577_s26  ;;  %s2450_s25 = scalar_lea.sflag [#allocation4], %s292_s18 }
 0x1c1   : > { %s2464_s16 = sshll.u32 %s2461_s11, 4  ;;  %s2465_s16 = int_to_ptr.hbm [resolvable:$true] %s2464_s16 }
 0x1c2   : > { %s2771_s17 = sshra.s32 %s2465_s16, 4  ;;  %s2772_s17 = int_to_ptr.hbm [resolvable:$true] %s2771_s17 }
 0x1c3   : > { %s2773_s12 = scalar_lea.hbm %s2772_s17, 32  ;;  %p2778_p3 = scmp.lt.s32.totalorder %s2772_s17, %s4558_s6 }
 0x1c4   : > { %p2774_p0 = scmp.ne.s32.totalorder %s2772_s17, %s2773_s12  ;;  %p2779_p4 = scmp.lt.s32.totalorder %s2777_s30, %s2773_s12 }
 0x1c6   : > { %1182 = vrot.lane.b32.xlu1 %v3535_v1, %s2844_s28  ;;  %1188 = vrot.lane.b32.xlu0 %v3583_v61, %s2844_s28  ;;  %p2775_p1 = pnand %p2774_p0, %p2921_p5  ;;  %p2780_p7 = por %p2779_p4, %p2778_p3 }
 0x1c7   : > { %1186 = vrot.lane.b32.xlu2 %v3575_v19, %s2844_s28 }
 0x1c8   : > { %p2776_p2 = pneg %p2775_p1 }
 0x1ca   : > { %p2781_p8 = pnand %p2780_p7, %p2776_p2 }
 0x1ce   : > { %1172 = vrot.lane.b32.xlu1 %v3583_v61, %s2845_s29  ;;  %1170 = vrot.lane.b32.xlu0 %v3575_v19, %s2845_s29 }
 0x1cf   : > { %1166 = vrot.lane.b32.xlu2 %v3535_v1, %s2845_s29 }
 0x1d6   : > { %1280 = vrot.lane.b32.xlu1 %v3545_v5, %s2839_s15  ;;  %1278 = vrot.lane.b32.xlu0 %v3535_v1, %s2839_s15 }
 0x1d7   : > { %1284 = vrot.lane.b32.xlu2 %v3583_v61, %s2839_s15 }
 0x1dd   : > { %v1263_v62 = vpop.permute.xlu2 %1262 }
 0x1de   : > { %1282 = vrot.lane.b32.xlu1 %v3575_v19, %s2839_s15 }
 0x1df   : > { %1298 = vperm.xlu2 %2665, %v1294_v7  }
 0x1e5   : > { %v1215_v29 = vpop.permute.xlu2 %1214 }
 0x1e6   : > { %451 = vperm.xlu1 %2664, %v437_v48  }
 0x1e7   : > { %456 = vperm.xlu2 %2665, %v438_v39  }
 0x1ed   : > { %v3632_v31 = vpop.permute.xlu2 %1232 }
 0x1f4   : > { %v1247_v57 = vpop.permute.xlu0 %1246  ;;  %v1231_v46 = vpop.permute.xlu1 %1230 }
 0x1fc   : > { %v3634_v53 = vpop.permute.xlu0 %1198  ;;  %v3640_v35 = vpop.permute.xlu1 %1248 }
 0x201   : > { %v1235_v6 = vpop.permute.xlu2 %1234 }
 0x202   : > { %v3638_v60 = vsel %vm375_vm3, %v1235_v6, %v1231_v46  ;;  %v1238_v34 = vsel %vm375_vm3, %v1231_v46, %v1235_v6 }
 0x203   : > { %v1242_v49 = vmul.f32 %v1238_v34, %v3059_v30 }
 0x204   : > { %v3642_v36 = vpop.permute.xlu0 %1264  ;;  %v3644_v63 = vpop.permute.xlu1 %1200 }
 0x209   : > { %v3648_v25 = vpop.permute.xlu2 %1252 }
 0x20a   : > { %v1255_v0 = vsel %vm391_vm0, %v3640_v35, %v3648_v25 }
 0x20b   : > { %v1260_v33 = vmul.f32 %v1255_v0, %v3015_v9 }
 0x20c   : > { %v3646_v38 = vpop.permute.xlu0 %1216 }
 0x20d   : > { %v3677_v37 = vand.u32 4294901760, %v1260_v33 }
 0x20f   : > { %v3697_v7 = vsub.f32 %v1260_v33, %v3677_v37  ;;  %v3733_v33 = vand.u32 4294901760, %v3545_v5 }
 0x211   : > { %v3668_v21 = vpop.permute.xlu2 %1184  ;;  %v4593_v0 = vand.u32 4294901760, %v3697_v7 }
 0x212   : > { %4678 = vst [vmem:[#allocation38_spill] sm:$0xff] %v3668_v21 }
 0x218   : > { %v1251_v22 = vpop.permute.xlu1 %1250  ;;  %v1267_v44 = vpop.permute.xlu0 %1266 }
 0x219   : > { %v3652_v16 = vsel %vm391_vm0, %v1251_v22, %v1247_v57  ;;  %v1270_v55 = vsel %vm407_vm1, %v1263_v62, %v1267_v44  ;;  %v3658_v28 = vsel %vm407_vm1, %v1267_v44, %v1263_v62  ;;  %v1254_v20 = vsel %vm391_vm0, %v1247_v57, %v1251_v22  ;;  %v3715_v22 = vpop.permute.xlu2 %1204 }
 0x21a   : > { %v1274_v26 = vmul.f32 %v1270_v55, %v3024_v14  ;;  %v1258_v32 = vmul.f32 %v1254_v20, %v3015_v9 }
 0x21c   : > { %v3671_v18 = vand.u32 4294901760, %v1274_v26  ;;  %v3689_v40 = vand.u32 4294901760, %v1258_v32 }
 0x21e   : > { %v3692_v17 = vsub.f32 %v1274_v26, %v3671_v18  ;;  %v3707_v39 = vsub.f32 %v1258_v32, %v3689_v40 }
 0x220   : > { %v3675_v3 = vpop.permute.xlu1 %1268  ;;  %v1219_v11 = vpop.permute.xlu0 %1218  ;;  %v4591_v62 = vand.u32 4294901760, %v3692_v17 }
 0x221   : > { %v1271_v59 = vsel %vm407_vm1, %v3642_v36, %v3675_v3  ;;  %v3685_v43 = vsel %vm359_vm5, %v1215_v29, %v1219_v11  ;;  %v1224_v26 = vsel %vm359_vm5, %v1219_v11, %v1215_v29  ;;  %v1209_v11 = vsel %vm343_vm6, %v3715_v22, %v3644_v63  ;;  %v3812_v27 = vpop.permute.xlu2 %1186 }
 0x222   : > { %4679 = vst [vmem:[#allocation39_spill] sm:$0xff] %v3685_v43  ;;  %v1276_v9 = vmul.f32 %v1271_v59, %v3024_v14  ;;  %v3704_v14 = vand.u32 4294901760, %v1242_v49  ;;  %v1371_v34 = vsub.f32 %v3692_v17, %v4591_v62  ;;  %v1377_v62 = vsub.f32 %v3697_v7, %v4593_v0 }
 0x223   : > { %v1212_v47 = vmul.f32 %v1209_v11, %v3121_v56  ;;  %v4681_v0 = vand.u32 4294901760, %v3707_v39  ;;  %4686 = vst [vmem:[#allocation44_spill] sm:$0xff] %v3812_v27 }
 0x224   : > { %v3694_v8 = vand.u32 4294901760, %v1276_v9  ;;  %v3744_v29 = vsub.f32 %v1242_v49, %v3704_v14 }
 0x225   : > { %v1383_v41 = vsub.f32 %v3707_v39, %v4681_v0 }
 0x226   : > { %v3700_v48 = vsub.f32 %v1276_v9, %v3694_v8  ;;  %1314 = vmatpush.msrb.mxu0 %v3694_v8  ;;  %1527 = vmatpush.msrb.mxu3 %v3694_v8  ;;  %v3755_v9 = vand.u32 4294901760, %v3535_v1 }
 0x228   : > { %v4592_v57 = vand.u32 4294901760, %v3700_v48  ;;  %v1203_v46 = vpop.permute.xlu1 %1202  ;;  %1469 = vmatpush.msrb.mxu2 %v3700_v48  ;;  %v3712_v6 = vpop.permute.xlu0 %1236  ;;  %1316 = vmatpush.msrb.mxu0 %v3671_v18  ;;  %v3789_v11 = vsub.f32 %v3535_v1, %v3755_v9 }
 0x229   : > { %v3720_v44 = vsel %vm343_vm6, %v3634_v53, %v1203_v46  ;;  %v1239_v55 = vsel %vm375_vm3, %v3632_v31, %v3712_v6  ;;  %1529 = vmatpush.msrb.mxu3 %v3671_v18 }
 0x22a   : > { %4680 = vst [vmem:[#allocation40_spill] sm:$0xff] %v3720_v44  ;;  %v1244_v20 = vmul.f32 %v1239_v55, %v3059_v30  ;;  %1318 = vmatpush.msrb.mxu0 %v3677_v37  ;;  %1472 = vmatpush.msrb.mxu2 %v3692_v17  ;;  %v1365_v32 = vsub.f32 %v3700_v48, %v4592_v57  ;;  %v4704_v44 = vld [vmem:[#allocation21_spill] sm:$0xff] }
 0x22b   : > { %1531 = vmatpush.msrb.mxu3 %v3677_v37  ;;  %v1226_v55 = vmul.f32 %v1224_v26, %v3112_v52  ;;  %v1208_v57 = vsel %vm343_vm6, %v1203_v46, %v3634_v53  ;;  %v3772_v26 = vsub.f32 %v3545_v5, %v3733_v33  ;;  %v1378_v53 = vand.u32 4294901760, %v1377_v62 }
 0x22c   : > { %v3751_v59 = vand.u32 4294901760, %v1244_v20  ;;  %1320 = vmatpush.msrb.mxu0 %v3689_v40  ;;  %1475 = vmatpush.msrb.mxu2 %v3697_v7  ;;  %v1366_v49 = vand.u32 4294901760, %v1365_v32  ;;  %v1372_v32 = vand.u32 4294901760, %v1371_v34  ;;  %v1210_v0 = vmul.f32 %v1208_v57, %v3121_v56 }
 0x22d   : > { %1533 = vmatpush.msrb.mxu3 %v3689_v40  ;;  %v3791_v34 = vand.u32 4294901760, %v1226_v55  ;;  %v3806_v57 = vand.u32 4294901760, %v1212_v47  ;;  %v4685_v62 = vand.u32 4294901760, %v3744_v29  ;;  %v4688_v45 = vand.u32 4294901760, %v3772_v26 }
 0x22e   : > { %1322 = vmatpush.msrb.mxu0 %v3751_v59  ;;  %v3768_v30 = vsub.f32 %v1244_v20, %v3751_v59  ;;  %1367 = vmatpush.msrb.mxu1 %v1366_v49 }
 0x22f   : > { %1478 = vmatpush.msrb.mxu2 %v3707_v39  ;;  %1535 = vmatpush.msrb.mxu3 %v3751_v59  ;;  %4683 = vst [vmem:[#allocation42_spill] sm:$0xff] %v3791_v34 }
 0x230   : > { %v3781_v46 = vpop.permute.xlu1 %1220  ;;  %v3783_v20 = vpop.permute.xlu0 %1168  ;;  %1324 = vmatpush.msrb.mxu0 %v3704_v14  ;;  %v4594_v5 = vand.u32 4294901760, %v3768_v30  ;;  %1373 = vmatpush.msrb.mxu1 %v1372_v32  ;;  %4684 = vst [vmem:[#allocation43_spill] sm:$0xff] %v3806_v57  ;;  %v1384_v32 = vand.u32 4294901760, %v1383_v41  ;;  %v3823_v41 = vsub.f32 %v1226_v55, %v3791_v34  ;;  %v3837_v55 = vsub.f32 %v1212_v47, %v3806_v57 }
 0x231   : > { %4682 = vst [vmem:[#allocation41_spill] sm:$0xff] %v3783_v20  ;;  %v1225_v49 = vsel %vm359_vm5, %v3781_v46, %v3646_v38  ;;  %1481 = vmatpush.msrb.mxu2 %v3768_v30  ;;  %1537 = vmatpush.msrb.mxu3 %v3704_v14 }
 0x232   : > { %v1228_v50 = vmul.f32 %v1225_v49, %v3112_v52  ;;  %1326 = vmatpush.msrb.mxu0 %v3733_v33  ;;  %v1389_v1 = vsub.f32 %v3768_v30, %v4594_v5  ;;  %1379 = vmatpush.msrb.mxu1 %v1378_v53  ;;  %v1395_v52 = vsub.f32 %v3744_v29, %v4685_v62  ;;  %v1162_v49 = vld [vmem:[#allocation7] sm:$0xff]  ;;  %v3819_v53 = vand.u32 4294901760, %v1210_v0 }
 0x233   : > { %1484 = vmatpush.msrb.mxu2 %v3744_v29  ;;  %1539 = vmatpush.msrb.mxu3 %v3733_v33  ;;  %v3833_v56 = vand.u32 4294901760, %v1162_v49 }
 0x234   : > { %v3814_v54 = vand.u32 4294901760, %v1228_v50  ;;  %1328 = vmatpush.msrb.mxu0 %v3755_v9  ;;  %v1390_v5 = vand.u32 4294901760, %v1389_v1  ;;  %4687 = vst [vmem:[#allocation45_spill] sm:$0xff] %v3819_v53  ;;  %1385 = vmatpush.msrb.mxu1 %v1384_v32  ;;  %v1401_v1 = vsub.f32 %v3772_v26, %v4688_v45  ;;  %v1396_v32 = vand.u32 4294901760, %v1395_v52 }
 0x235   : > { %1487 = vmatpush.msrb.mxu2 %v3772_v26  ;;  %1541 = vmatpush.msrb.mxu3 %v3755_v9  ;;  %v3858_v58 = vsub.f32 %v1210_v0, %v3819_v53  ;;  %v3865_v10 = vsub.f32 %v1162_v49, %v3833_v56 }
 0x236   : > { %1330 = vmatpush.msrb.mxu0 %v3814_v54  ;;  %v3828_v62 = vsub.f32 %v1228_v50, %v3814_v54  ;;  %1391 = vmatpush.msrb.mxu1 %v1390_v5  ;;  %v4691_v50 = vand.u32 4294901760, %v3789_v11  ;;  %v1402_v13 = vand.u32 4294901760, %v1401_v1 }
 0x237   : > { %1490 = vmatpush.msrb.mxu2 %v3789_v11  ;;  %1543 = vmatpush.msrb.mxu3 %v3814_v54 }
 0x238   : > { %v3840_v51 = vpop.permute.xlu1 %1182  ;;  %v3842_v42 = vpop.permute.xlu0 %1188  ;;  %1332 = vmatpush.msrb.mxu0 %v3791_v34  ;;  %v1407_v45 = vsub.f32 %v3789_v11, %v4691_v50  ;;  %1397 = vmatpush.msrb.mxu1 %v1396_v32  ;;  %v4693_v32 = vand.u32 4294901760, %v3828_v62 }
 0x239   : > { %4689 = vst [vmem:[#allocation46_spill] sm:$0xff] %v3840_v51  ;;  %v1192_v47 = vsel %vm327_vm7, %v3812_v27, %v3840_v51  ;;  %v1193_v52 = vsel %vm327_vm7, %v3842_v42, %v3668_v21  ;;  %1493 = vmatpush.msrb.mxu2 %v3828_v62  ;;  %1545 = vmatpush.msrb.mxu3 %v3791_v34  ;;  %v3884_v51 = vpop.permute.xlu2 %1166  ;;  %v3893_v27 = vand.u32 4294901760, %v1164_v23 }
 0x23a   : > { %4690 = vst [vmem:[#allocation47_spill] sm:$0xff] %v3842_v42  ;;  %v1194_v50 = vmul.f32 %v1192_v47, %v4692_v2  ;;  %v1196_v5 = vmul.f32 %v1193_v52, %v4692_v2  ;;  %1334 = vmatpush.msrb.mxu0 %v3806_v57  ;;  %v1413_v0 = vsub.f32 %v3828_v62, %v4693_v32  ;;  %v1408_v49 = vand.u32 4294901760, %v1407_v45 }
 0x23b   : > { %1403 = vmatpush.msrb.mxu1 %v1402_v13  ;;  %1496 = vmatpush.msrb.mxu2 %v3823_v41  ;;  %v4696_v52 = vand.u32 4294901760, %v3823_v41  ;;  %4697 = vst [vmem:[#allocation49_spill] sm:$0xff] %v3884_v51  ;;  %v3891_v45 = vand.u32 4294901760, %v3865_v10 }
 0x23c   : > { %v3873_v47 = vand.u32 4294901760, %v1194_v50  ;;  %v3875_v2 = vand.u32 4294901760, %v1196_v5  ;;  %1547 = vmatpush.msrb.mxu3 %v3806_v57  ;;  %1336 = vmatpush.msrb.mxu0 %v3819_v53  ;;  %v1414_v1 = vand.u32 4294901760, %v1413_v0  ;;  %v4699_v0 = vand.u32 4294901760, %v3837_v55 }
 0x23d   : > { %v1419_v32 = vsub.f32 %v3823_v41, %v4696_v52  ;;  %1409 = vmatpush.msrb.mxu1 %v1408_v49  ;;  %1499 = vmatpush.msrb.mxu2 %v3837_v55  ;;  %4698 = vst [vmem:[#allocation50_spill] sm:$0xff] %v3891_v45 }
 0x23e   : > { %4694 = vst [vmem:[#allocation18_spill] sm:$0xff] %v3873_v47  ;;  %v3888_v13 = vsub.f32 %v1196_v5, %v3875_v2  ;;  %1549 = vmatpush.msrb.mxu3 %v3819_v53  ;;  %1338 = vmatpush.msrb.mxu0 %v3875_v2  ;;  %v1425_v52 = vsub.f32 %v3837_v55, %v4699_v0  ;;  %v4703_v0 = vand.u32 4294901760, %v3858_v58 }
 0x23f   : > { %4695 = vst [vmem:[#allocation48_spill] sm:$0xff] %v3875_v2  ;;  %v3901_v49 = vsub.f32 %v1194_v50, %v3873_v47  ;;  %1415 = vmatpush.msrb.mxu1 %v1414_v1  ;;  %1502 = vmatpush.msrb.mxu2 %v3858_v58  ;;  %v1420_v1 = vand.u32 4294901760, %v1419_v32 }
 0x240   : > { %v3904_v5 = vpop.permute.xlu1 %1172  ;;  %v3906_v12 = vpop.permute.xlu0 %1170  ;;  %1551 = vmatpush.msrb.mxu3 %v3875_v2  ;;  %v1431_v42 = vsub.f32 %v3858_v58, %v4703_v0  ;;  %1340 = vmatpush.msrb.mxu0 %v3873_v47  ;;  %v1348_v2 = vsub.f32 %v3865_v10, %v3891_v45  ;;  %v1426_v32 = vand.u32 4294901760, %v1425_v52 }
 0x241   : > { %4700 = vst [vmem:[#allocation51_spill] sm:$0xff] %v3901_v49  ;;  %v1177_v53 = vsel %vm312_vm8, %v3904_v5, %v3783_v20  ;;  %v1176_v50 = vsel %vm312_vm8, %v3906_v12, %v3884_v51  ;;  %v3927_v20 = vsub.f32 %v1164_v23, %v3893_v27  ;;  %1421 = vmatpush.msrb.mxu1 %v1420_v1  ;;  %v4705_v51 = vand.u32 4294901760, %v3888_v13 }
 0x242   : > { %4701 = vst [vmem:[#allocation52_spill] sm:$0xff] %v3904_v5  ;;  %v1180_v57 = vmul.f32 %v1177_v53, %v4704_v44  ;;  %v1178_v21 = vmul.f32 %v1176_v50, %v4704_v44  ;;  %1505 = vmatpush.msrb.mxu2 %v3888_v13  ;;  %v4607_v53 = vand.u32 4294901760, %v3901_v49  ;;  %1553 = vmatpush.msrb.mxu3 %v3873_v47  ;;  %v1432_v23 = vand.u32 4294901760, %v1431_v42 }
 0x243   : > { %4702 = vst [vmem:[#allocation53_spill] sm:$0xff] %v3906_v12  ;;  %v1437_v0 = vsub.f32 %v3888_v13, %v4705_v51  ;;  %v1163_v12 = vld [vmem:[#allocation7 + $0x8] sm:$0xff]  ;;  %1427 = vmatpush.msrb.mxu1 %v1426_v32  ;;  %v3948_v5 = vand.u32 4294901760, %v1348_v2  ;;  %v3951_v47 = vand.u32 4294901760, %v3927_v20 }
 0x244   : > { %v3934_v44 = vand.u32 4294901760, %v1180_v57  ;;  %v3936_v50 = vand.u32 4294901760, %v1178_v21  ;;  %1508 = vmatpush.msrb.mxu2 %v3901_v49  ;;  %v1443_v52 = vsub.f32 %v3901_v49, %v4607_v53  ;;  %v1308_v32 = vsel %vm1306_vm9, %v1163_v12, 0 }
 0x245   : > { %v1438_v1 = vand.u32 4294901760, %v1437_v0  ;;  %4707 = vst [vmem:[#allocation54_spill] sm:$0xff] %v3948_v5  ;;  %1433 = vmatpush.msrb.mxu1 %v1432_v23  ;;  %v1285_v0 = vpop.permute.xlu2 %1284  ;;  %v3966_v23 = vand.u32 4294901760, %v1308_v32  ;;  %v1356_v49 = vsub.f32 %v3927_v20, %v3951_v47 }
 0x246   : > { %4706 = vst [vmem:[#allocation21_spill] sm:$0xff] %v3934_v44  ;;  %1342 = vmatpush.msrb.mxu0 %v3934_v44  ;;  %1555 = vmatpush.msrb.mxu3 %v3934_v44  ;;  %v3946_v51 = vsub.f32 %v1180_v57, %v3934_v44  ;;  %v3955_v42 = vsub.f32 %v1178_v21, %v3936_v50  ;;  %v1444_v12 = vand.u32 4294901760, %v1443_v52  ;;  %v4709_v21 = vld [vmem:[#allocation13_spill] sm:$0xff] }
 0x247   : > { %1439 = vmatpush.msrb.mxu1 %v1438_v1  ;;  %v1273_v52 = vsel %vm407_vm1, %v3675_v3, %v3642_v36  ;;  %v4711_v36 = vand.u32 4294901760, %v3692_v17  ;;  %v3997_v3 = vsub.f32 %v1308_v32, %v3966_v23 }
 0x248   : > { %v1281_v53 = vpop.permute.xlu1 %1280  ;;  %1344 = vmatpush.msrb.mxu0 %v3936_v50  ;;  %1511 = vmatpush.msrb.mxu2 %v3946_v51  ;;  %v4611_v57 = vand.u32 4294901760, %v3946_v51  ;;  %v4612_v43 = vand.u32 4294901760, %v3955_v42 }
 0x249   : > { %v1287_v2 = vsel %vm423_vm2, %v1281_v53, %v1285_v0  ;;  %v3964_v44 = vsel %vm423_vm2, %v1285_v0, %v1281_v53  ;;  %1557 = vmatpush.msrb.mxu3 %v3936_v50  ;;  %1350 = vmatmul.f32.vlgmr.msrb.gmra.mxu0 %v3948_v5  ;;  %v4710_v53 = vand.u32 4294901760, %v3700_v48  ;;  %v1295_v48 = vld [vmem:[%s4557_s5 + $0x8] sm:$0xff]  ;;  %v4713_v5 = vand.u32 4294901760, %v3697_v7 }
 0x24a   : > { %4708 = vst [vmem:[#allocation55_spill] sm:$0xff] %v3964_v44  ;;  %v1292_v34 = vmul.f32 %v1287_v2, %v4709_v21  ;;  %v1449_v1 = vsub.f32 %v3946_v51, %v4611_v57  ;;  %1445 = vmatpush.msrb.mxu1 %v1444_v12  ;;  %1514 = vmatpush.msrb.mxu2 %v3955_v42  ;;  %v1165_v12 = vld [vmem:[#allocation7 + $0x18] sm:$0xff]  ;;  %v4714_v7 = vand.u32 4294901760, %v3707_v39 }
 0x24b   : > { %1574 = vmatpush.msra.mxu0 %v4710_v53  ;;  %1561 = vmatmul.f32.vlgmr.msrb.gmra.mxu3 %v3891_v45  ;;  %v1455_v57 = vsub.f32 %v3955_v42, %v4612_v43  ;;  %v4003_v43 = vand.u32 4294901760, %v1356_v49  ;;  %v4712_v45 = vld [vmem:[#allocation16_spill] sm:$0xff]  ;;  %v1311_v17 = vsel %vm1306_vm9, %v1165_v12, 0 }
 0x24c   : > { %v3983_v0 = vand.u32 4294901760, %v1292_v34  ;;  %v1450_v2 = vand.u32 4294901760, %v1449_v1  ;;  %1517 = vmatmul.f32.vlgmr.msrb.gmra.mxu2 %v3865_v10  ;;  %v1277_v44 = vmul.f32 %v1273_v52, %v4712_v45  ;;  %1303 = vperm.xlu0 %2666, %v1295_v48   ;;  %v1275_v49 = vmul.f32 %v3658_v28, %v4712_v45  ;;  %v4715_v45 = vld [vmem:[#allocation14_spill] sm:$0xff] }
 0x24d   : > { %1578 = vmatpush.msra.mxu0 %v4711_v36  ;;  %v1456_v53 = vand.u32 4294901760, %v1455_v57  ;;  %v4036_v39 = vand.u32 4294901760, %v1311_v17  ;;  %v4716_v48 = vand.u32 4294901760, %v3768_v30 }
 0x24e   : > { %v4000_v1 = vsub.f32 %v1292_v34, %v3983_v0  ;;  %1451 = vmatpush.msrb.mxu1 %v1450_v2  ;;  %1700 = vmatpush.msra.mxu2 %v3983_v0  ;;  %v1257_v34 = vsel %vm391_vm0, %v3648_v25, %v3640_v35  ;;  %v4014_v2 = vpop.permute.xlu0 %1278  ;;  %v4028_v35 = vand.u32 4294901760, %v3997_v3  ;;  %v4039_v12 = vand.u32 4294901760, %v1277_v44 }
 0x24f   : > { %1582 = vmatpush.msra.mxu0 %v4713_v5  ;;  %v1261_v52 = vmul.f32 %v1257_v34, %v4715_v45  ;;  %v4717_v34 = vand.u32 4294901760, %v3744_v29 }
 0x250   : > { %v1736_v32 = vand.u32 4294901760, %v4000_v1  ;;  %v4016_v57 = vpop.permute.xlu1 %1282  ;;  %1457 = vmatpush.msrb.mxu1 %v1456_v53  ;;  %v4049_v53 = vand.u32 4294901760, %v1275_v49  ;;  %v1706_v30 = vsub.f32 %v3997_v3, %v4028_v35 }
 0x251   : > { %1586 = vmatpush.msra.mxu0 %v4714_v7  ;;  %v1286_v5 = vsel %vm423_vm2, %v4014_v2, %v4016_v57  ;;  %1459 = vmatmul.f32.vlgmr.msrb.gmra.mxu1 %v3833_v56  ;;  %v4066_v7 = vsub.f32 %v1311_v17, %v4036_v39  ;;  %v4068_v29 = vand.u32 4294901760, %v1261_v52  ;;  %v4719_v17 = vld [vmem:[#allocation17_spill] sm:$0xff] }
 0x252   : > { %v1290_v25 = vmul.f32 %v1286_v5, %v4709_v21  ;;  %1645 = vmatpush.msra.mxu1 %v3694_v8  ;;  %v1737_v28 = vsub.f32 %v4000_v1, %v1736_v32  ;;  %1358 = vmatmul.f32.gmra.mxu0 %v4003_v43  ;;  %v1259_v21 = vmul.f32 %v3652_v16, %v4715_v45  ;;  %v4088_v45 = vand.u32 4294901760, %v1706_v30 }
 0x253   : > { %1590 = vmatpush.msra.mxu0 %v4716_v48  ;;  %1567 = vmatmul.f32.gmra.mxu3 %v3951_v47  ;;  %v4071_v5 = vsub.f32 %v1277_v44, %v4039_v12  ;;  %v4720_v44 = vand.u32 4294901760, %v3789_v11 }
 0x254   : > { %v4043_v36 = vand.u32 4294901760, %v1290_v25  ;;  %1647 = vmatpush.msra.mxu1 %v3671_v18  ;;  %v1738_v8 = vand.u32 4294901760, %v1737_v28  ;;  %1522 = vmatmul.f32.gmra.mxu2 %v3927_v20  ;;  %v1241_v18 = vsel %vm375_vm3, %v3712_v6, %v3632_v31  ;;  %v4718_v28 = vand.u32 4294901760, %v3772_v26 }
 0x255   : > { %1594 = vmatpush.msra.mxu0 %v4717_v34  ;;  %v4081_v6 = vsub.f32 %v1275_v49, %v4049_v53  ;;  %v4093_v48 = vand.u32 4294901760, %v1259_v21  ;;  %v4101_v49 = vand.u32 4294901760, %v4066_v7  ;;  %v4721_v34 = vand.u32 4294901760, %v3828_v62  ;;  %v1047_v62 = vpop.f32.mrf.mxu1 }
 0x256   : > { %1649 = vmatpush.msra.mxu1 %v3677_v37  ;;  %1702 = vmatpush.msra.mxu2 %v4043_v36  ;;  %v4063_v16 = vsub.f32 %v1290_v25, %v4043_v36  ;;  %v1245_v25 = vmul.f32 %v1241_v18, %v4719_v17 }
 0x257   : > { %1598 = vmatpush.msra.mxu0 %v4718_v28  ;;  %1739 = vmatpush.msra.mxu3 %v1738_v8  ;;  %v1926_v8 = vand.u32 4294901760, %v4071_v5 }
 0x258   : > { %1651 = vmatpush.msra.mxu1 %v3689_v40  ;;  %1771 = vmatpush.msrb.mxu2 %v4000_v1  ;;  %v4077_v31 = vpop.permute.xlu1 %451  ;;  %v1742_v37 = vand.u32 4294901760, %v4063_v16  ;;  %v1243_v40 = vmul.f32 %v3638_v60, %v4719_v17  ;;  %v4111_v18 = vand.u32 4294901760, %v1245_v25  ;;  %v4722_v17 = vand.u32 4294901760, %v3823_v41 }
 0x259   : > { %1602 = vmatpush.msra.mxu0 %v4720_v44  ;;  %v863_v26 = vadd.f32 %v3557_v24, %v4077_v31  ;;  %1463 = vmatmul.f32.gmra.mxu1 %v3893_v27  ;;  %v4104_v24 = vsub.f32 %v1261_v52, %v4068_v29  ;;  %v4620_v52 = vand.u32 4294901760, %v4081_v6  ;;  %v4723_v41 = vand.u32 4294901760, %v3837_v55 }
 0x25a   : > { %1653 = vmatpush.msra.mxu1 %v3751_v59  ;;  %1774 = vmatpush.msrb.mxu2 %v4063_v16  ;;  %v1743_v11 = vsub.f32 %v4063_v16, %v1742_v37  ;;  %v998_v59 = vpop.f32.mrf.mxu0  ;;  %v4117_v44 = vand.u32 4294901760, %v1243_v40  ;;  %v4139_v55 = vsub.f32 %v1245_v25, %v4111_v18 }
 0x25b   : > { %v945_v60 = vadd.f32 %v3559_v15, %v863_v26  ;;  %1606 = vmatpush.msra.mxu0 %v4721_v34  ;;  %v4120_v15 = vsub.f32 %v1259_v21, %v4093_v48  ;;  %v4616_v21 = vand.u32 4294901760, %v4104_v24  ;;  %v4724_v34 = vand.u32 4294901760, %v3858_v58 }
 0x25c   : > { %1655 = vmatpush.msra.mxu1 %v3704_v14  ;;  %v1744_v30 = vand.u32 4294901760, %v1743_v11  ;;  %1708 = vmatmul.f32.vlgmr.msra.gmra.mxu2 %v4088_v45  ;;  %v1714_v14 = vsub.f32 %v4066_v7, %v4101_v49  ;;  %v1927_v11 = vsub.f32 %v4071_v5, %v1926_v8  ;;  %v4756_v4 = vand.u32 4294901760, %v4139_v55 }
 0x25d   : > { %v999_v28 = vadd.f32 %v998_v59, %v945_v60  ;;  %1610 = vmatpush.msra.mxu0 %v4722_v17  ;;  %1876 = vmatpush.msra.mxu2 %v4039_v12  ;;  %v1223_v60 = vsel %vm359_vm5, %v3646_v38, %v3781_v46  ;;  %v1933_v59 = vsub.f32 %v4081_v6, %v4620_v52  ;;  %v4615_v25 = vand.u32 4294901760, %v4120_v15 }
 0x25e   : > { %1657 = vmatpush.msra.mxu1 %v3733_v33  ;;  %1745 = vmatpush.msra.mxu3 %v1744_v30  ;;  %v1109_v33 = vpop.f32.mrf.mxu2  ;;  %v4148_v30 = vand.u32 4294901760, %v3583_v61  ;;  %v4151_v46 = vsub.f32 %v1243_v40, %v4117_v44  ;;  %v4155_v58 = vand.u32 4294901760, %v1714_v14  ;;  %v1939_v40 = vsub.f32 %v4104_v24, %v4616_v21  ;;  %v4727_v14 = vld [vmem:[#allocation51_spill] sm:$0xff] }
 0x25f   : > { %v1048_v26 = vadd.f32 %v1047_v62, %v999_v28  ;;  %1614 = vmatpush.msra.mxu0 %v4723_v41  ;;  %1878 = vmatpush.msra.mxu2 %v4049_v53  ;;  %v4725_v28 = vld [vmem:[#allocation19_spill] sm:$0xff]  ;;  %v4726_v62 = vand.u32 4294901760, %v3888_v13  ;;  %v1207_v13 = vsel %vm343_vm6, %v3644_v63, %v3715_v22  ;;  %v1945_v63 = vsub.f32 %v4120_v15, %v4615_v25 }
 0x260   : > { %1659 = vmatpush.msra.mxu1 %v3755_v9  ;;  %1801 = vmatpush.msrb.mxu3 %v3983_v0  ;;  %v1151_v9 = vpop.f32.mrf.mxu3  ;;  %v1229_v17 = vmul.f32 %v1223_v60, %v4725_v28  ;;  %v1934_v60 = vand.u32 4294901760, %v1933_v59  ;;  %v1940_v59 = vand.u32 4294901760, %v1939_v40  ;;  %v4737_v25 = vand.u32 4294901760, %v3955_v42 }
 0x261   : > { %1618 = vmatpush.msra.mxu0 %v4724_v34  ;;  %v1110_v38 = vadd.f32 %v1109_v33, %v1048_v26  ;;  %1880 = vmatpush.msra.mxu2 %v4068_v29  ;;  %v1928_v26 = vand.u32 4294901760, %v1927_v11  ;;  %v4728_v11 = vand.u32 4294901760, %v4727_v14  ;;  %v4617_v33 = vand.u32 4294901760, %v4139_v55 }
 0x262   : > { %1661 = vmatpush.msra.mxu1 %v3814_v54  ;;  %1747 = vmatmul.f32.vlgmr.msra.gmra.mxu3 %v3966_v23  ;;  %v4170_v54 = vand.u32 4294901760, %v3575_v19  ;;  %v4181_v34 = vsub.f32 %v3583_v61, %v4148_v30  ;;  %v4190_v22 = vand.u32 4294901760, %v1229_v17  ;;  %v4618_v61 = vand.u32 4294901760, %v4151_v46 }
 0x263   : > { %1622 = vmatpush.msra.mxu0 %v4726_v62  ;;  %v4165_v41 = vadd.f32 %v1151_v9, %v1110_v38  ;;  %1803 = vmatpush.msrb.mxu3 %v4043_v36  ;;  %v4729_v38 = vld [vmem:[#allocation39_spill] sm:$0xff]  ;;  %v4730_v62 = vld [vmem:[#allocation42_spill] sm:$0xff]  ;;  %v1951_v40 = vsub.f32 %v4139_v55, %v4617_v33  ;;  %v1946_v21 = vand.u32 4294901760, %v1945_v63 }
 0x264   : > { %1882 = vmatpush.msra.mxu2 %v4093_v48  ;;  %v1227_v9 = vmul.f32 %v4729_v38, %v4725_v28  ;;  %1663 = vmatpush.msra.mxu1 %v4730_v62  ;;  %v4732_v28 = vand.u32 4294901760, %v3946_v51  ;;  %v4200_v38 = vsub.f32 %v3575_v19, %v4170_v54  ;;  %v4734_v51 = vld [vmem:[#allocation40_spill] sm:$0xff]  ;;  %v4219_v33 = vsub.f32 %v1229_v17, %v4190_v22  ;;  %v4740_v63 = vld [vmem:[#allocation46_spill] sm:$0xff] }
 0x265   : > { %1929 = vmatpush.msra.mxu3 %v1928_v26  ;;  %1626 = vmatpush.msra.mxu0 %v4728_v11  ;;  %v4731_v26 = vld [vmem:[#allocation20_spill] sm:$0xff]  ;;  %v4733_v11 = vld [vmem:[#allocation43_spill] sm:$0xff] }
 0x266   : > { %1716 = vmatmul.f32.gmra.mxu2 %v4155_v58  ;;  %v1213_v14 = vmul.f32 %v1207_v13, %v4731_v26  ;;  %1665 = vmatpush.msra.mxu1 %v4733_v11  ;;  %v4207_v62 = vand.u32 4294901760, %v1227_v9  ;;  %v1211_v13 = vmul.f32 %v4734_v51, %v4731_v26  ;;  %v4736_v11 = vld [vmem:[#allocation38_spill] sm:$0xff]  ;;  %v1957_v26 = vsub.f32 %v4151_v46, %v4618_v61 }
 0x267   : > { %1884 = vmatpush.msra.mxu2 %v4111_v18  ;;  %1935 = vmatpush.msra.mxu3 %v1934_v60  ;;  %v4619_v60 = vand.u32 4294901760, %v4181_v34  ;;  %v4621_v42 = vand.u32 4294901760, %v4200_v38  ;;  %v1952_v61 = vand.u32 4294901760, %v1951_v40  ;;  %v4745_v40 = vld [vmem:[#allocation18_spill] sm:$0xff] }
 0x268   : > { %1630 = vmatpush.msra.mxu0 %v4732_v28  ;;  %v4735_v28 = vld [vmem:[#allocation47_spill] sm:$0xff]  ;;  %v4226_v51 = vand.u32 4294901760, %v1213_v14 }
 0x269   : > { %1886 = vmatpush.msra.mxu2 %v4117_v44  ;;  %1941 = vmatpush.msra.mxu3 %v1940_v59  ;;  %v1191_v19 = vsel %vm327_vm7, %v4736_v11, %v4735_v28  ;;  %v4738_v59 = vld [vmem:[#allocation45_spill] sm:$0xff]  ;;  %v4741_v28 = vld [vmem:[#allocation22_spill] sm:$0xff]  ;;  %v1963_v1 = vsub.f32 %v4181_v34, %v4619_v60  ;;  %v1974_v60 = vand.u32 4294901760, %v4219_v33  ;;  %v1969_v16 = vsub.f32 %v4200_v38, %v4621_v42 }
 0x26a   : > { %1634 = vmatpush.msra.mxu0 %v4737_v25  ;;  %1667 = vmatpush.msra.mxu1 %v4738_v59  ;;  %v4739_v25 = vld [vmem:[#allocation44_spill] sm:$0xff]  ;;  %v1197_v11 = vmul.f32 %v1191_v19, %v4741_v28 }
 0x26b   : > { %1888 = vmatpush.msra.mxu2 %v4148_v30  ;;  %1636 = vmatmul.f32.vlgmr.msra.gmra.mxu0 %v3833_v56  ;;  %v1190_v17 = vsel %vm327_vm7, %v4740_v63, %v4739_v25  ;;  %v4742_v59 = vld [vmem:[#allocation48_spill] sm:$0xff]  ;;  %v4744_v25 = vld [vmem:[#allocation41_spill] sm:$0xff] }
 0x26c   : > { %1834 = vmatpush.msrb.mxu0 %v1736_v32  ;;  %1947 = vmatpush.msra.mxu3 %v1946_v21  ;;  %v4242_v32 = vsub.f32 %v1227_v9, %v4207_v62  ;;  %v4244_v21 = vand.u32 4294901760, %v1211_v13  ;;  %v4743_v19 = vld [vmem:[#allocation52_spill] sm:$0xff]  ;;  %v4256_v9 = vsub.f32 %v1213_v14, %v4226_v51  ;;  %v1195_v52 = vmul.f32 %v1190_v17, %v4741_v28  ;;  %v4748_v28 = vld [vmem:[#allocation23_spill] sm:$0xff] }
 0x26d   : > { %1669 = vmatpush.msra.mxu1 %v4742_v59  ;;  %1751 = vmatmul.f32.gmra.mxu3 %v4036_v39  ;;  %v1175_v63 = vsel %vm312_vm8, %v4744_v25, %v4743_v19  ;;  %v1958_v59 = vand.u32 4294901760, %v1957_v26  ;;  %v4747_v19 = vld [vmem:[#allocation49_spill] sm:$0xff]  ;;  %v1964_v14 = vand.u32 4294901760, %v1963_v1  ;;  %v1970_v1 = vand.u32 4294901760, %v1969_v16 }
 0x26e   : > { %1890 = vmatpush.msra.mxu2 %v4170_v54  ;;  %1838 = vmatpush.msrb.mxu0 %v1742_v37  ;;  %v4264_v37 = vand.u32 4294901760, %v1197_v11  ;;  %v4272_v17 = vsub.f32 %v1211_v13, %v4244_v21  ;;  %v1181_v25 = vmul.f32 %v1175_v63, %v4748_v28  ;;  %v1980_v42 = vand.u32 4294901760, %v4242_v32 }
 0x26f   : > { %1953 = vmatpush.msra.mxu3 %v1952_v61  ;;  %1671 = vmatpush.msra.mxu1 %v4745_v40  ;;  %v4746_v61 = vld [vmem:[#allocation53_spill] sm:$0xff]  ;;  %v1986_v63 = vand.u32 4294901760, %v4256_v9 }
 0x270   : > { %1777 = vmatmul.f32.vlgmr.msrb.gmra.mxu2 %v3997_v3  ;;  %2031 = vmatpush.msra.mxu0 %v4071_v5  ;;  %v1174_v26 = vsel %vm312_vm8, %v4747_v19, %v4746_v61  ;;  %v4749_v40 = vld [vmem:[#allocation21_spill] sm:$0xff]  ;;  %v1975_v61 = vsub.f32 %v4219_v33, %v1974_v60  ;;  %v4289_v19 = vsub.f32 %v1197_v11, %v4264_v37  ;;  %v4622_v16 = vand.u32 4294901760, %v4272_v17 }
 0x271   : > { %1892 = vmatpush.msra.mxu2 %v4190_v22  ;;  %1959 = vmatpush.msra.mxu3 %v1958_v59  ;;  %v4282_v59 = vand.u32 4294901760, %v1195_v52  ;;  %v1179_v13 = vmul.f32 %v1174_v26, %v4748_v28  ;;  %v4752_v5 = vand.u32 4294901760, %v4104_v24 }
 0x272   : > { %1673 = vmatpush.msra.mxu1 %v4749_v40  ;;  %2034 = vmatpush.msra.mxu0 %v4081_v6  ;;  %v1976_v11 = vand.u32 4294901760, %v1975_v61  ;;  %v1987_v40 = vsub.f32 %v4256_v9, %v1986_v63 }
 0x273   : > { %1894 = vmatpush.msra.mxu2 %v4207_v62  ;;  %1965 = vmatpush.msra.mxu3 %v1964_v14  ;;  %v4293_v14 = vand.u32 4294901760, %v1181_v25  ;;  %v4303_v26 = vsub.f32 %v1195_v52, %v4282_v59  ;;  %v4305_v28 = vand.u32 4294901760, %v1179_v13 }
 0x274   : > { %1675 = vmatpush.msra.mxu1 %v3936_v50  ;;  %2037 = vmatpush.msra.mxu0 %v4104_v24  ;;  %v1981_v50 = vsub.f32 %v4242_v32, %v1980_v42 }
 0x275   : > { %1896 = vmatpush.msra.mxu2 %v4226_v51  ;;  %1640 = vmatmul.f32.gmra.mxu0 %v3893_v27  ;;  %v4315_v61 = vsub.f32 %v1181_v25, %v4293_v14  ;;  %v1988_v25 = vand.u32 4294901760, %v1987_v40 }
 0x276   : > { %1677 = vmatmul.f32.vlgmr.msra.gmra.mxu1 %v3833_v56  ;;  %1971 = vmatpush.msra.mxu3 %v1970_v1  ;;  %v1982_v52 = vand.u32 4294901760, %v1981_v50  ;;  %v1993_v1 = vsub.f32 %v4272_v17, %v4622_v16 }
 0x277   : > { %1863 = vmatpush.msrb.mxu1 %v3983_v0  ;;  %1807 = vmatmul.f32.vlgmr.msrb.gmra.mxu3 %v4028_v35  ;;  %v4625_v0 = vand.u32 4294901760, %v4289_v19 }
 0x278   : > { %1898 = vmatpush.msra.mxu2 %v4244_v21  ;;  %2040 = vmatpush.msra.mxu0 %v4120_v15  ;;  %v1994_v16 = vand.u32 4294901760, %v1993_v1 }
 0x279   : > { %1865 = vmatpush.msrb.mxu1 %v4043_v36  ;;  %1977 = vmatpush.msra.mxu3 %v1976_v11  ;;  %v4325_v36 = vsub.f32 %v1179_v13, %v4305_v28  ;;  %v4623_v11 = vand.u32 4294901760, %v4303_v26  ;;  %v1999_v50 = vsub.f32 %v4289_v19, %v4625_v0  ;;  %v4624_v13 = vand.u32 4294901760, %v4315_v61 }
 0x27a   : > { %1782 = vmatmul.f32.gmra.mxu2 %v4066_v7  ;;  %2043 = vmatpush.msra.mxu0 %v4139_v55 }
 0x27b   : > { %1900 = vmatpush.msra.mxu2 %v4264_v37  ;;  %2089 = vmatpush.msra.mxu1 %v4039_v12  ;;  %v2005_v40 = vsub.f32 %v4303_v26, %v4623_v11  ;;  %v2000_v1 = vand.u32 4294901760, %v1999_v50  ;;  %v4750_v11 = vld [vmem:[#allocation54_spill] sm:$0xff] }
 0x27c   : > { %1983 = vmatpush.msra.mxu3 %v1982_v52  ;;  %2046 = vmatpush.msra.mxu0 %v4151_v46  ;;  %v2016_v52 = vand.u32 4294901760, %v4325_v36 }
 0x27d   : > { %1902 = vmatpush.msra.mxu2 %v4282_v59  ;;  %2091 = vmatpush.msra.mxu1 %v4049_v53 }
 0x27e   : > { %1989 = vmatpush.msra.mxu3 %v1988_v25  ;;  %2049 = vmatpush.msra.mxu0 %v4181_v34  ;;  %v2011_v25 = vsub.f32 %v4315_v61, %v4624_v13  ;;  %v2017_v50 = vsub.f32 %v4325_v36, %v2016_v52  ;;  %v4751_v13 = vand.u32 4294901760, %v4081_v6  ;;  %v1288_v6 = vsel %vm423_vm2, %v4016_v57, %v4014_v2 }
 0x27f   : > { %1904 = vmatpush.msra.mxu2 %v4293_v14  ;;  %2093 = vmatpush.msra.mxu1 %v4068_v29  ;;  %v4757_v57 = vand.u32 4294901760, %v4151_v46 }
 0x280   : > { %1681 = vmatmul.f32.gmra.mxu1 %v3893_v27  ;;  %1995 = vmatpush.msra.mxu3 %v1994_v16  ;;  %v2006_v16 = vand.u32 4294901760, %v2005_v40  ;;  %v2012_v0 = vand.u32 4294901760, %v2011_v25  ;;  %v4766_v25 = vld [vmem:[#allocation25_spill] sm:$0xff] }
 0x281   : > { %1813 = vmatmul.f32.gmra.mxu3 %v4101_v49  ;;  %1906 = vmatpush.msra.mxu2 %v4305_v28 }
 0x282   : > { %2052 = vmatpush.msra.mxu0 %v4200_v38  ;;  %2095 = vmatpush.msra.mxu1 %v4093_v48 }
 0x283   : > { %1840 = vmatmul.f32.vlgmr.msrb.gmra.mxu0 %v3966_v23  ;;  %2001 = vmatpush.msra.mxu3 %v2000_v1 }
 0x284   : > { %2136 = vmatpush.msrb.mxu2 %v1926_v8  ;;  %2055 = vmatpush.msra.mxu0 %v4219_v33  ;;  %v2018_v8 = vand.u32 4294901760, %v2017_v50  ;;  %v4762_v33 = vand.u32 4294901760, %v4289_v19 }
 0x285   : > { %1912 = vmatmul.f32.vlgmr.msra.gmra.mxu2 %v4750_v11  ;;  %2097 = vmatpush.msra.mxu1 %v4111_v18  ;;  %v4753_v11 = vld [vmem:[#allocation15_spill] sm:$0xff] }
 0x286   : > { %2007 = vmatpush.msra.mxu3 %v2006_v16  ;;  %2140 = vmatpush.msrb.mxu2 %v4751_v13  ;;  %v4754_v13 = vld [vmem:[#allocation55_spill] sm:$0xff]  ;;  %v1291_v24 = vmul.f32 %v1288_v6, %v4753_v11 }
 0x287   : > { %2058 = vmatpush.msra.mxu0 %v4242_v32  ;;  %2099 = vmatpush.msra.mxu1 %v4117_v44  ;;  %v1293_v40 = vmul.f32 %v4754_v13, %v4753_v11  ;;  %v4767_v11 = vld [vmem:[#allocation26_spill] sm:$0xff] }
 0x288   : > { %2013 = vmatpush.msra.mxu3 %v2012_v0  ;;  %2144 = vmatpush.msrb.mxu2 %v4752_v5  ;;  %v4755_v0 = vand.u32 4294901760, %v4120_v15  ;;  %v4392_v15 = vand.u32 4294901760, %v1291_v24 }
 0x289   : > { %2061 = vmatpush.msra.mxu0 %v4256_v9  ;;  %2101 = vmatpush.msra.mxu1 %v4148_v30  ;;  %v4385_v2 = vand.u32 4294901760, %v1293_v40 }
 0x28a   : > { %1867 = vmatmul.f32.vlgmr.msrb.gmra.mxu1 %v3966_v23  ;;  %2019 = vmatpush.msra.mxu3 %v2018_v8 }
 0x28b   : > { %2148 = vmatpush.msrb.mxu2 %v4755_v0  ;;  %2021 = vmatmul.f32.vlgmr.msra.gmra.mxu3 %v3833_v56  ;;  %v2297_v55 = vsub.f32 %v1293_v40, %v4385_v2 }
 0x28c   : > { %2064 = vmatpush.msra.mxu0 %v4272_v17  ;;  %2103 = vmatpush.msra.mxu1 %v4170_v54 }
 0x28d   : > { %2207 = vmatpush.msrb.mxu3 %v4039_v12  ;;  %1844 = vmatmul.f32.gmra.mxu0 %v4036_v39  ;;  %v4758_v12 = vand.u32 4294901760, %v4181_v34  ;;  %v2298_v46 = vand.u32 4294901760, %v2297_v55  ;;  %v4763_v34 = vand.u32 4294901760, %v4303_v26 }
 0x28e   : > { %2152 = vmatpush.msrb.mxu2 %v4756_v4  ;;  %2067 = vmatpush.msra.mxu0 %v4289_v19  ;;  %v4768_v4 = vld [vmem:[#allocation27_spill] sm:$0xff] }
 0x28f   : > { %2105 = vmatpush.msra.mxu1 %v4190_v22  ;;  %2209 = vmatpush.msrb.mxu3 %v4049_v53  ;;  %v4759_v53 = vand.u32 4294901760, %v4200_v38 }
 0x290   : > { %2156 = vmatpush.msrb.mxu2 %v4757_v57  ;;  %2070 = vmatpush.msra.mxu0 %v4303_v26  ;;  %v4765_v26 = vld [vmem:[#allocation24_spill] sm:$0xff] }
 0x291   : > { %2107 = vmatpush.msra.mxu1 %v4207_v62  ;;  %2211 = vmatpush.msrb.mxu3 %v4068_v29  ;;  %v2303_v29 = vsub.f32 %v1291_v24, %v4392_v15 }
 0x292   : > { %2160 = vmatpush.msrb.mxu2 %v4758_v12  ;;  %2073 = vmatpush.msra.mxu0 %v4315_v61  ;;  %v4769_v12 = vld [vmem:[#allocation28_spill] sm:$0xff] }
 0x293   : > { %2109 = vmatpush.msra.mxu1 %v4226_v51  ;;  %2213 = vmatpush.msrb.mxu3 %v4093_v48  ;;  %v2304_v48 = vand.u32 4294901760, %v2303_v29 }
 0x294   : > { %1871 = vmatmul.f32.gmra.mxu1 %v4036_v39  ;;  %2164 = vmatpush.msrb.mxu2 %v4759_v53 }
 0x295   : > { %2076 = vmatpush.msra.mxu0 %v4325_v36  ;;  %2111 = vmatpush.msra.mxu1 %v4244_v21 }
 0x296   : > { %2215 = vmatpush.msrb.mxu3 %v4111_v18  ;;  %2079 = vmatmul.f32.vlgmr.msra.gmra.mxu0 %v3865_v10  ;;  %v2299_v10 = vsub.f32 %v2297_v55, %v2298_v46  ;;  %v2305_v18 = vsub.f32 %v2303_v29, %v2304_v48 }
 0x297   : > { %2168 = vmatpush.msrb.mxu2 %v1974_v60  ;;  %2262 = vmatpush.msrb.mxu0 %v4385_v2  ;;  %v4476_v60 = vpop.permute.xlu2 %1298 }
 0x298   : > { %2113 = vmatpush.msra.mxu1 %v4264_v37  ;;  %2217 = vmatpush.msrb.mxu3 %v4117_v44  ;;  %v4760_v44 = vand.u32 4294901760, %v4272_v17 }
 0x299   : > { %2172 = vmatpush.msrb.mxu2 %v1980_v42  ;;  %2264 = vmatpush.msrb.mxu0 %v4392_v15 }
 0x29a   : > { %2115 = vmatpush.msra.mxu1 %v4282_v59  ;;  %2219 = vmatpush.msrb.mxu3 %v4148_v30  ;;  %v4761_v30 = vld [vmem:[#allocation50_spill] sm:$0xff] }
 0x29b   : > { %2333 = vmatpush.msra.mxu0 %v2297_v55  ;;  %1920 = vmatmul.f32.gmra.mxu2 %v4003_v43  ;;  %v2300_v43 = vand.u32 4294901760, %v2299_v10 }
 0x29c   : > { %2176 = vmatpush.msrb.mxu2 %v1986_v63  ;;  %2117 = vmatpush.msra.mxu1 %v4293_v14 }
 0x29d   : > { %2221 = vmatpush.msrb.mxu3 %v4170_v54  ;;  %2336 = vmatpush.msra.mxu0 %v2303_v29  ;;  %v2306_v54 = vand.u32 4294901760, %v2305_v18  ;;  %v4770_v29 = vld [vmem:[#allocation29_spill] sm:$0xff] }
 0x29e   : > { %2025 = vmatmul.f32.gmra.mxu3 %v3893_v27  ;;  %2180 = vmatpush.msrb.mxu2 %v4760_v44  ;;  %v4771_v44 = vld [vmem:[#allocation32_spill] sm:$0xff] }
 0x29f   : > { %2119 = vmatpush.msra.mxu1 %v4305_v28  ;;  %2223 = vmatpush.msrb.mxu3 %v4190_v22  ;;  %v4764_v22 = vand.u32 4294901760, %v4315_v61  ;;  %v4485_v6 = vpop.permute.xlu2 %456 }
 0x2a0   : > { %2123 = vmatmul.f32.vlgmr.msra.gmra.mxu1 %v4761_v30  ;;  %2184 = vmatpush.msrb.mxu2 %v4762_v33  ;;  %v4772_v30 = vld [vmem:[#allocation30_spill] sm:$0xff] }
 0x2a1   : > { %2301 = vmatpush.msrb.mxu1 %v2300_v43  ;;  %2225 = vmatpush.msrb.mxu3 %v4207_v62 }
 0x2a2   : > { %2084 = vmatmul.f32.gmra.mxu0 %v3927_v20  ;;  %2188 = vmatpush.msrb.mxu2 %v4763_v34  ;;  %v4468_v20 = vpop.f32.mrf.mxu2 }
 0x2a3   : > { %2307 = vmatpush.msrb.mxu1 %v2306_v54  ;;  %2227 = vmatpush.msrb.mxu3 %v4226_v51 }
 0x2a4   : > { %2192 = vmatpush.msrb.mxu2 %v4764_v22 }
 0x2a5   : > { %2363 = vmatpush.msra.mxu1 %v4385_v2  ;;  %2229 = vmatpush.msrb.mxu3 %v4244_v21 }
 0x2a6   : > { %2196 = vmatpush.msrb.mxu2 %v2016_v52 }
 0x2a7   : > { %2365 = vmatpush.msra.mxu1 %v4392_v15  ;;  %2198 = vmatmul.f32.vlgmr.msrb.gmra.mxu2 %v3833_v56 }
 0x2a8   : > { %2231 = vmatpush.msrb.mxu3 %v4264_v37  ;;  %2396 = vmatpush.msra.mxu2 %v2298_v46 }
 0x2a9   : > { %2129 = vmatmul.f32.gmra.mxu1 %v3951_v47  ;;  %v4472_v47 = vpop.f32.mrf.mxu0 }
 0x2aa   : > { %2233 = vmatpush.msrb.mxu3 %v4282_v59  ;;  %2400 = vmatpush.msra.mxu2 %v2304_v48 }
 0x2ab   : > { %2270 = vmatmul.f32.vlgmr.msrb.gmra.mxu0 %v4088_v45  ;;  %v4474_v45 = vpop.f32.mrf.mxu1 }
 0x2ac   : > { %2235 = vmatpush.msrb.mxu3 %v4293_v14 }
 0x2ae   : > { %2237 = vmatpush.msrb.mxu3 %v4305_v28  ;;  %v520_v28 = vadd.f32 %v4765_v26, %v4077_v31  ;;  %v528_v31 = vadd.f32 %v4768_v4, %v4485_v6 }
 0x2af   : > { %2239 = vmatmul.f32.vlgmr.msrb.gmra.mxu3 %v3833_v56  ;;  %2202 = vmatmul.f32.gmra.mxu2 %v3893_v27 }
 0x2b0   : > { %2425 = vmatpush.msra.mxu3 %v4385_v2  ;;  %v602_v16 = vadd.f32 %v4766_v25, %v520_v28  ;;  %v606_v46 = vadd.f32 %v4770_v29, %v528_v31 }
 0x2b1   : > { %2309 = vmatmul.f32.vlgmr.msrb.gmra.mxu1 %v3966_v23 }
 0x2b2   : > { %2427 = vmatpush.msra.mxu3 %v4392_v15  ;;  %v656_v13 = vadd.f32 %v4767_v11, %v602_v16  ;;  %v661_v33 = vadd.f32 %v4772_v30, %v606_v46 }
 0x2b3   : > { %2278 = vmatmul.f32.gmra.mxu0 %v4155_v58 }
 0x2b4   : > { %v705_v55 = vadd.f32 %v4769_v12, %v656_v13 }
 0x2b6   : > { %v767_v43 = vadd.f32 %v4771_v44, %v705_v55 }
 0x2b7   : > { %2243 = vmatmul.f32.gmra.mxu3 %v3893_v27  ;;  %2402 = vmatmul.f32.vlgmr.msra.gmra.mxu2 %v3966_v23  ;;  %v4470_v27 = vpop.f32.mrf.mxu3 }
 0x2b9   : > { %2313 = vmatmul.f32.gmra.mxu1 %v4036_v39 }
 0x2bb   : > { %2339 = vmatmul.f32.vlgmr.msra.gmra.mxu0 %v3997_v3 }
 0x2be   : > { %v4479_v51 = vpop.permute.xlu0 %1303 }
 0x2bf   : > { %2429 = vmatmul.f32.vlgmr.msra.gmra.mxu3 %v3966_v23  ;;  %2406 = vmatmul.f32.gmra.mxu2 %v4036_v39 }
 0x2c1   : > { %2369 = vmatmul.f32.vlgmr.msra.gmra.mxu1 %v4028_v35 }
 0x2c3   : > { %2344 = vmatmul.f32.gmra.mxu0 %v4066_v7 }
 0x2c6   : > { %v1351_v23 = vpop.f32.mrf.mxu0 }
 0x2c7   : > { %2433 = vmatmul.f32.gmra.mxu3 %v4036_v39  ;;  %v1352_v39 = vadd.f32 %v1351_v23, %v4476_v60 }
 0x2c9   : > { %2375 = vmatmul.f32.gmra.mxu1 %v4101_v49 }
 0x2ce   : > { %v1562_v3 = vpop.f32.mrf.mxu3  ;;  %v1460_v35 = vpop.f32.mrf.mxu1 }
 0x2cf   : > { %v1518_v56 = vpop.f32.mrf.mxu2  ;;  %v1359_v7 = vpop.f32.mrf.mxu0  ;;  %v1461_v49 = vadd.f32 %v1460_v35, %v1352_v39  ;;  %v4774_v35 = vld [vmem:[#allocation31_spill] sm:$0xff] }
 0x2d0   : > { %v1360_v9 = vadd.f32 %v1359_v7, %v4479_v51  ;;  %v711_v39 = vadd.f32 %v4774_v35, %v661_v33 }
 0x2d1   : > { %v1519_v21 = vadd.f32 %v1518_v56, %v1461_v49 }
 0x2d3   : > { %v1563_v17 = vadd.f32 %v1562_v3, %v1519_v21  ;;  %v4773_v3 = vld [vmem:[#allocation34_spill] sm:$0xff] }
 0x2d4   : > { %v809_v23 = vadd.f32 %v4773_v3, %v767_v43  ;;  %v4778_v43 = vld [vmem:[#allocation37_spill] sm:$0xff] }
 0x2d6   : > { %v1568_v38 = vpop.f32.mrf.mxu3  ;;  %v1464_v42 = vpop.f32.mrf.mxu1 }
 0x2d7   : > { %v1523_v58 = vpop.f32.mrf.mxu2  ;;  %v1465_v59 = vadd.f32 %v1464_v42, %v1360_v9 }
 0x2d9   : > { %v1524_v52 = vadd.f32 %v1523_v58, %v1465_v59 }
 0x2db   : > { %v1569_v5 = vadd.f32 %v1568_v38, %v1524_v52 }
 0x2df   : > { %v1709_v62 = vpop.f32.mrf.mxu2 }
 0x2e5   : > { %v1748_v32 = vpop.f32.mrf.mxu3 }
 0x2e8   : > { %v1637_v37 = vpop.f32.mrf.mxu0 }
 0x2e9   : > { %v1638_v63 = vadd.f32 %v1637_v37, %v1563_v17  ;;  %v1717_v19 = vpop.f32.mrf.mxu2  ;;  %v4776_v17 = vld [vmem:[#allocation35_spill] sm:$0xff] }
 0x2f0   : > { %v1752_v36 = vpop.f32.mrf.mxu3 }
 0x2f2   : > { %v1641_v50 = vpop.f32.mrf.mxu0 }
 0x2f3   : > { %v1678_v14 = vpop.f32.mrf.mxu1  ;;  %v1642_v40 = vadd.f32 %v1641_v50, %v1569_v5  ;;  %v1778_v0 = vpop.f32.mrf.mxu2 }
 0x2f4   : > { %v1679_v61 = vadd.f32 %v1678_v14, %v1638_v63 }
 0x2f6   : > { %v1710_v1 = vadd.f32 %v1709_v62, %v1679_v61 }
 0x2f8   : > { %v1749_v8 = vadd.f32 %v1748_v32, %v1710_v1  ;;  %v4775_v32 = vld [vmem:[#allocation33_spill] sm:$0xff] }
 0x2f9   : > { %v771_v21 = vadd.f32 %v4775_v32, %v711_v39 }
 0x2fa   : > { %v1779_v2 = vadd.f32 %v1778_v0, %v1749_v8  ;;  %v1808_v15 = vpop.f32.mrf.mxu3 }
 0x2fb   : > { %v813_v59 = vadd.f32 %v4776_v17, %v771_v21 }
 0x2fc   : > { %v1809_v48 = vadd.f32 %v1808_v15, %v1779_v2 }
 0x2fd   : > { %v1682_v24 = vpop.f32.mrf.mxu1  ;;  %v1783_v34 = vpop.f32.mrf.mxu2 }
 0x2fe   : > { %v1683_v57 = vadd.f32 %v1682_v24, %v1642_v40 }
 0x300   : > { %v1718_v53 = vadd.f32 %v1717_v19, %v1683_v57  ;;  %v1841_v10 = vpop.f32.mrf.mxu0 }
 0x301   : > { %v1842_v54 = vadd.f32 %v1841_v10, %v1809_v48 }
 0x302   : > { %v1753_v18 = vadd.f32 %v1752_v36, %v1718_v53 }
 0x304   : > { %v1784_v56 = vadd.f32 %v1783_v34, %v1753_v18  ;;  %v1814_v38 = vpop.f32.mrf.mxu3 }
 0x306   : > { %v1815_v49 = vadd.f32 %v1814_v38, %v1784_v56 }
 0x307   : > { %v1868_v22 = vpop.f32.mrf.mxu1 }
 0x308   : > { %v1869_v58 = vadd.f32 %v1868_v22, %v1842_v54  ;;  %v1913_v28 = vpop.f32.mrf.mxu2 }
 0x309   : > { %v1914_v16 = vadd.f32 %v1913_v28, %v4476_v60  ;;  %v4777_v60 = vld [vmem:[#allocation36_spill] sm:$0xff] }
 0x30a   : > { %v2437_v7 = vadd.f32 %v1869_v58, %v809_v23  ;;  %v1845_v42 = vpop.f32.mrf.mxu0  ;;  %v871_v46 = vadd.f32 %v4777_v60, %v4485_v6 }
 0x30b   : > { %v1846_v9 = vadd.f32 %v1845_v42, %v1815_v49 }
 0x30c   : > { %v2441_v62 = vmax.f32 %v2437_v7, 0.0  ;;  %v949_v30 = vadd.f32 %v4778_v43, %v871_v46 }
 0x30e   : > { %2445 = vst [vmem:[%s4499_s20] sm:$0xff] %v2441_v62  ;;  %v2022_v52 = vpop.f32.mrf.mxu3  ;;  %v1004_v3 = vadd.f32 %v4472_v47, %v949_v30 }
 0x30f   : > { %v2023_v5 = vadd.f32 %v2022_v52, %v1914_v16 }
 0x310   : > { %v1054_v39 = vadd.f32 %v4474_v45, %v1004_v3 }
 0x311   : > { %v1872_v37 = vpop.f32.mrf.mxu1 }
 0x312   : > { %v1873_v63 = vadd.f32 %v1872_v37, %v1846_v9  ;;  %v1114_v21 = vadd.f32 %v4468_v20, %v1054_v39 }
 0x313   : > { %v2080_v26 = vpop.f32.mrf.mxu0 }
 0x314   : > { %v2439_v19 = vadd.f32 %v1873_v63, %v813_v59  ;;  %v2081_v40 = vadd.f32 %v2080_v26, %v2023_v5  ;;  %v1156_v17 = vadd.f32 %v4470_v27, %v1114_v21 }
 0x316   : > { %v2443_v14 = vmax.f32 %v2439_v19, 0.0 }
 0x318   : > { %2447 = vst [vmem:[%s4499_s20 + $0x10] sm:$0xff] %v2443_v14 }
 0x31d   : > { %v2124_v61 = vpop.f32.mrf.mxu1 }
 0x31e   : > { %v1921_v1 = vpop.f32.mrf.mxu2  ;;  %v2125_v24 = vadd.f32 %v2124_v61, %v2081_v40 }
 0x31f   : > { %v2085_v36 = vpop.f32.mrf.mxu0  ;;  %v1922_v11 = vadd.f32 %v1921_v1, %v4479_v51 }
 0x321   : > { %v2026_v8 = vpop.f32.mrf.mxu3 }
 0x322   : > { %v2027_v4 = vadd.f32 %v2026_v8, %v1922_v11 }
 0x324   : > { %v2086_v15 = vadd.f32 %v2085_v36, %v2027_v4 }
 0x326   : > { %v2130_v25 = vpop.f32.mrf.mxu1 }
 0x327   : > { %v2131_v48 = vadd.f32 %v2130_v25, %v2086_v15 }
 0x328   : > { %v2271_v50 = vpop.f32.mrf.mxu0 }
 0x32a   : > { %v2199_v13 = vpop.f32.mrf.mxu2 }
 0x32b   : > { %v2200_v2 = vadd.f32 %v2199_v13, %v2125_v24 }
 0x32e   : > { %v2310_v0 = vpop.f32.mrf.mxu1 }
 0x330   : > { %v2279_v31 = vpop.f32.mrf.mxu0 }
 0x332   : > { %v2240_v57 = vpop.f32.mrf.mxu3  ;;  %v2203_v55 = vpop.f32.mrf.mxu2 }
 0x333   : > { %v2241_v12 = vadd.f32 %v2240_v57, %v2200_v2  ;;  %v2204_v18 = vadd.f32 %v2203_v55, %v2131_v48 }
 0x335   : > { %v2272_v53 = vadd.f32 %v2271_v50, %v2241_v12 }
 0x336   : > { %v2314_v29 = vpop.f32.mrf.mxu1 }
 0x337   : > { %v2311_v51 = vadd.f32 %v2310_v0, %v2272_v53 }
 0x338   : > { %v2340_v10 = vpop.f32.mrf.mxu0 }
 0x339   : > { %v2341_v34 = vadd.f32 %v2340_v10, %v2311_v51 }
 0x33a   : > { %v2244_v44 = vpop.f32.mrf.mxu3  ;;  %v2403_v54 = vpop.f32.mrf.mxu2 }
 0x33b   : > { %v2245_v33 = vadd.f32 %v2244_v44, %v2204_v18 }
 0x33d   : > { %v2280_v22 = vadd.f32 %v2279_v31, %v2245_v33 }
 0x33e   : > { %v2370_v56 = vpop.f32.mrf.mxu1 }
 0x33f   : > { %v2371_v23 = vadd.f32 %v2370_v56, %v2341_v34  ;;  %v2315_v58 = vadd.f32 %v2314_v29, %v2280_v22 }
 0x340   : > { %v2345_v6 = vpop.f32.mrf.mxu0 }
 0x341   : > { %v2404_v38 = vadd.f32 %v2403_v54, %v2371_v23  ;;  %v2346_v49 = vadd.f32 %v2345_v6, %v2315_v58 }
 0x342   : > { %v2430_v35 = vpop.f32.mrf.mxu3  ;;  %v2407_v32 = vpop.f32.mrf.mxu2 }
 0x343   : > { %v2431_v7 = vadd.f32 %v2430_v35, %v2404_v38 }
 0x345   : > { %v2438_v62 = vadd.f32 %v2431_v7, %v4165_v41 }
 0x346   : > { %v2376_v42 = vpop.f32.mrf.mxu1 }
 0x347   : > { %v2442_v47 = vmax.f32 %v2438_v62, 0.0  ;;  %v2377_v9 = vadd.f32 %v2376_v42, %v2346_v49 }
 0x349   : > { %2446 = vst [vmem:[%s4499_s20 + $0x8] sm:$0xff] %v2442_v47  ;;  %v2408_v37 = vadd.f32 %v2407_v32, %v2377_v9 }
 0x34a   : > { %v2434_v45 = vpop.f32.mrf.mxu3 }
 0x34b   : > { %v2435_v41 = vadd.f32 %v2434_v45, %v2408_v37 }
 0x34d   : > { %v2440_v59 = vadd.f32 %v2435_v41, %v1156_v17 }
 0x34f   : > { %v2444_v63 = vmax.f32 %v2440_v59, 0.0 }
 0x351   : > { %2448 = vst [vmem:[%s4499_s20 + $0x18] sm:$0xff] %v2444_v63 }
 0x352   : > { %2784 = shalt.err (!%p2781_p8)
}
 0x353   : > { %s2847_s15 = smov 256  }
 0x354   : > { %2590 = dma.vmem_to_hbm [thread:$0]  (%p2921_p5), %s2463_s13, 512, %s2465_s16, %s2450_s25, %s2847_s15, %s2847_s15, %s2844_s28  }
 0x355 PF: > { %p2612_p9 = scmp.ge.s32.totalorder %s2827_s24, 2  ;;  %s2479_s18 = sand.u32 1, %s2815_s21  }
 0x356   : > { %s2480_s19 = scalar_lea.sflag [#allocation4], %s2479_s18 }
 0x357   : > { %p2603_p10 = pnand %p2612_p9, %p2925_p6 }
 0x359   : > { %p2604_p11 = pneg %p2603_p10 }
 0x35b   : > { %2810 = dma.done.wait (%p2604_p11), %s2480_s19, 512  }
 0x35c   : > { %2812 = vsyncadd (%p2604_p11), %s2480_s19, 4294966784  ;;  %s4779_s20 = sld [smem:[#allocation12_spill]]  ;;  %p18_p12 = scmp.ge.s32.totalorder %s2908_s27, 4  }
 0x35d   : > { %s4780_s21 = smov %s2819_s22  ;;  %s4781_s22 = smov %s2823_s23 }
 0x35e   : > { %s4783_s24 = smov %s2908_s27  ;;  %20 = sbr.rel (!%p18_p12) target bundleno = 8 (0x8), region = 99 }
 0x362   : > { %s4782_s23 = smov %s4779_s20 }
 0x363   :  { %2486 = vsyncpa [#allocation3], 1 }
 0x364   :  { %2488 = vsyncpa [#allocation3 + $0x1], 1 }
 0x365   :  { %2489 = vsyncpa [#allocation6], 1 }
 0x366   :  { %2490 = vsyncpa [#allocation4], 1 }
 0x367   :  { %2492 = vsyncpa [#allocation4 + $0x1], 1 }

</bundles_post_ra>
